<compile_context>
chip_gen: v7x
topology: tpu7x:2x2x1
jax: 0.10.0
libtpu: 0.0.40
codegen_flags: <defaults>
</compile_context>

<pallas_src>
import jax
import jax.numpy as jnp
from jax import lax
from jax.experimental import pallas as pl
from jax.experimental.pallas import tpu as pltpu


# ---------------------------------------------------------------------------
# helpers
# ---------------------------------------------------------------------------
_VMEM_LIMIT = 32 * 1024 * 1024  # safe on v5e/v6e/v7x; tile plans use far less


def _round_up(x: int, m: int) -> int:
    return (x + m - 1) // m * m


def _sublane_multiple(dtype) -> int:
    # f32 -> 8, bf16 -> 16, int8/fp8 -> 32 (sublane packing).
    itemsize = jnp.dtype(dtype).itemsize
    return max(8, 32 // itemsize)


def _pick_tile(padded: int, cap: int) -> int:
    """Largest 128-multiple divisor of `padded` (itself a 128-multiple) <= cap."""
    units = padded // 128
    max_units = max(1, min(cap // 128, units))
    for c in range(max_units, 0, -1):
        if units % c == 0:
            return c * 128
    return 128


def _pick_l_tile(lp: int, tl_max: int) -> int:
    # Aim for >= 2 L tiles (when Lp > 128) so both v7x TensorCores get work and
    # each drives its own W DMA stream.
    half = _round_up((lp + 1) // 2, 128)
    return _pick_tile(lp, min(tl_max, half))


def _w_blockspec(block_shape, index_map, w_buffers):
    if w_buffers is None:
        return pl.BlockSpec(block_shape, index_map)
    # Deeper pipelining on the dominant (W) stream; sweep 2 vs 3 on hardware.
    return pl.BlockSpec(block_shape, index_map, pipeline_mode=pl.Buffered(w_buffers))


# ---------------------------------------------------------------------------
# Kernel bodies
# ---------------------------------------------------------------------------
_NT_DIMS = (((1,), (1,)), ((), ()))  # contract last dim of both operands (x @ W^T)


def _make_linear_kernel(k_axis: int, direct: bool, precision):
    """y[b, l] = sum_f x[b, f] * W[l, f], K tiled on grid axis `k_axis`."""
    if direct:  # output dtype is f32 -> accumulate straight into the resident block
        def kernel(x_ref, w_ref, y_ref):
            @pl.when(pl.program_id(k_axis) == 0)
            def _init():
                y_ref[...] = jnp.zeros_like(y_ref)

            y_ref[...] += lax.dot_general(
                x_ref[...], w_ref[...], _NT_DIMS,
                precision=precision, preferred_element_type=jnp.float32)
        return kernel

    def kernel(x_ref, w_ref, y_ref, acc_ref):
        k = pl.program_id(k_axis)

        @pl.when(k == 0)
        def _init():
            acc_ref[...] = jnp.zeros_like(acc_ref)

        acc_ref[...] += lax.dot_general(
            x_ref[...], w_ref[...], _NT_DIMS,
            precision=precision, preferred_element_type=jnp.float32)

        @pl.when(k == pl.num_programs(k_axis) - 1)
        def _store():
            y_ref[...] = acc_ref[...].astype(y_ref.dtype)
    return kernel


def _make_fused_kernel(act_fn, direct: bool, precision):
    """Same matmul plus activation(W) on the resident W tile (EUP slot, free
    under the MXU / W DMA). Grid is (L, K); each aw block written exactly once."""
    if direct:
        def kernel(x_ref, w_ref, y_ref, aw_ref):
            @pl.when(pl.program_id(1) == 0)
            def _init():
                y_ref[...] = jnp.zeros_like(y_ref)

            y_ref[...] += lax.dot_general(
                x_ref[...], w_ref[...], _NT_DIMS,
                precision=precision, preferred_element_type=jnp.float32)
            aw_ref[...] = act_fn(w_ref[...].astype(jnp.float32)).astype(aw_ref.dtype)
        return kernel

    def kernel(x_ref, w_ref, y_ref, aw_ref, acc_ref):
        k = pl.program_id(1)

        @pl.when(k == 0)
        def _init():
            acc_ref[...] = jnp.zeros_like(acc_ref)

        acc_ref[...] += lax.dot_general(
            x_ref[...], w_ref[...], _NT_DIMS,
            precision=precision, preferred_element_type=jnp.float32)
        aw_ref[...] = act_fn(w_ref[...].astype(jnp.float32)).astype(aw_ref.dtype)

        @pl.when(k == pl.num_programs(1) - 1)
        def _store():
            y_ref[...] = acc_ref[...].astype(y_ref.dtype)
    return kernel


def _make_elementwise_kernel(act_fn):
    def kernel(w_ref, o_ref):
        o_ref[...] = act_fn(w_ref[...].astype(jnp.float32)).astype(o_ref.dtype)
    return kernel


# ---------------------------------------------------------------------------
# Layer: mirrors BaseMFSLayer (nn.Linear(n_features, n_labels, bias=False),
# weight init = 1.0, plus an activation applied to the weight).
# ---------------------------------------------------------------------------
class BaseMFSLayerPallas:
    def __init__(self, n_features: int, n_labels: int, activation=jax.nn.sigmoid,
                 dtype=jnp.float32):
        self.n_features = n_features
        self.n_labels = n_labels
        self._activation = activation  # any jnp-traceable elementwise callable
        self._lp = _round_up(n_labels, 128)
        self._fp = _round_up(n_features, 128)
        # Pad ONCE at construction (zeros in padding are exact for the matmul;
        # activation of padded rows/cols is sliced off on request).
        self._wp = jnp.pad(
            jnp.ones((n_labels, n_features), dtype=dtype),
            ((0, self._lp - n_labels), (0, self._fp - n_features)))

    # -- parameter access ----------------------------------------------------
    def set_weight(self, weight: jax.Array):
        assert weight.shape == (self.n_labels, self.n_features), weight.shape
        self._wp = jnp.pad(
            weight, ((0, self._lp - self.n_labels), (0, self._fp - self.n_features)))

    def get_weight(self) -> jax.Array:
        return self._wp[: self.n_labels, : self.n_features]

    # -- activation on an arbitrary 2-D tensor (spec: self.activation(x)) ----
    def activation(self, x: jax.Array) -> jax.Array:
        R, C = x.shape
        sub = _sublane_multiple(x.dtype)
        tr = min(_round_up(R, sub), 512)
        rp, cp = _round_up(R, tr), _round_up(C, 128)
        tf = _pick_tile(cp, 2048)
        xp = x if (rp, cp) == (R, C) else jnp.pad(x, ((0, rp - R), (0, cp - C)))
        out = pl.pallas_call(
            _make_elementwise_kernel(self._activation),
            out_shape=jax.ShapeDtypeStruct((rp, cp), x.dtype),
            grid=(rp // tr, cp // tf),
            in_specs=[pl.BlockSpec((tr, tf), lambda i, j: (i, j))],
            out_specs=pl.BlockSpec((tr, tf), lambda i, j: (i, j)),
            compiler_params=pltpu.CompilerParams(
                dimension_semantics=("parallel", "parallel"),
                vmem_limit_bytes=_VMEM_LIMIT),
        )(xp)
        return out[:R, :C]

    # -- activated weight (standalone, tiled, lane-dense) ---------------------
    def get_activated_weight(self, *, out_dtype=None, unpad: bool = True) -> jax.Array:
        out_dtype = out_dtype or self._wp.dtype
        lp, fp = self._lp, self._fp
        tl = _pick_tile(lp, 512)
        tf = _pick_tile(fp, 2048)  # full F when F <= 2048: widest unmasked vst
        out = pl.pallas_call(
            _make_elementwise_kernel(self._activation),
            out_shape=jax.ShapeDtypeStruct((lp, fp), out_dtype),
            grid=(lp // tl, fp // tf),
            in_specs=[pl.BlockSpec((tl, tf), lambda i, j: (i, j))],
            out_specs=pl.BlockSpec((tl, tf), lambda i, j: (i, j)),
            compiler_params=pltpu.CompilerParams(
                dimension_semantics=("parallel", "parallel"),
                vmem_limit_bytes=_VMEM_LIMIT),
        )(self._wp)
        return out[: self.n_labels, : self.n_features] if unpad else out

    # -- bias-free linear: y = x @ W^T ----------------------------------------
    def fs_linear(self, x: jax.Array, *, tl_max: int = 512, tk_max: int = 2048,
                  tb_max: int = 128, precision=None, w_buffers=None) -> jax.Array:
        B, F = x.shape
        assert F == self.n_features, (F, self.n_features)
        lp, fp = self._lp, self._fp

        sub = _sublane_multiple(x.dtype)
        tb = min(_round_up(B, sub), tb_max)
        bp = _round_up(B, tb)
        tl = _pick_l_tile(lp, tl_max)
        tk = _pick_tile(fp, tk_max)

        xp = x if (bp, fp) == (B, F) else jnp.pad(x, ((0, bp - B), (0, fp - F)))

        direct = jnp.dtype(x.dtype) == jnp.dtype(jnp.float32)
        kernel = _make_linear_kernel(2, direct, precision)
        scratch = [] if direct else [pltpu.VMEM((tb, tl), jnp.float32)]

        y = pl.pallas_call(
            kernel,
            out_shape=jax.ShapeDtypeStruct((bp, lp), x.dtype),
            grid=(bp // tb, lp // tl, fp // tk),
            in_specs=[
                pl.BlockSpec((tb, tk), lambda b, l, k: (b, k)),
                _w_blockspec((tl, tk), lambda b, l, k: (l, k), w_buffers),
            ],
            out_specs=pl.BlockSpec((tb, tl), lambda b, l, k: (b, l)),
            scratch_shapes=scratch,
            compiler_params=pltpu.CompilerParams(
                dimension_semantics=("parallel", "parallel", "arbitrary"),
                vmem_limit_bytes=_VMEM_LIMIT),
        )(xp, self._wp)
        return y[:B, : self.n_labels]

    # -- fused: y = x @ W^T and activation(W), streaming W from HBM once ------
    def fs_linear_and_activated_weight(self, x: jax.Array, *, tl_max: int = 512,
                                       tk_max: int = 2048, aw_dtype=None,
                                       precision=None, w_buffers=None,
                                       unpad_aw: bool = True):
        B, F = x.shape
        assert F == self.n_features, (F, self.n_features)
        lp, fp = self._lp, self._fp
        aw_dtype = aw_dtype or self._wp.dtype

        sub = _sublane_multiple(x.dtype)
        bp = _round_up(B, sub)
        if bp > 256:
            # Batch too large for a single resident accumulator tile: fall back
            # so the aw output block is never revisited across a batch grid.
            y = self.fs_linear(x, tl_max=tl_max, tk_max=tk_max,
                               precision=precision, w_buffers=w_buffers)
            aw = self.get_activated_weight(out_dtype=aw_dtype, unpad=unpad_aw)
            return y, aw

        tl = _pick_l_tile(lp, tl_max)
        tk = _pick_tile(fp, tk_max)
        xp = x if (bp, fp) == (B, F) else jnp.pad(x, ((0, bp - B), (0, fp - F)))

        direct = jnp.dtype(x.dtype) == jnp.dtype(jnp.float32)
        kernel = _make_fused_kernel(self._activation, direct, precision)
        scratch = [] if direct else [pltpu.VMEM((bp, tl), jnp.float32)]

        y, aw = pl.pallas_call(
            kernel,
            out_shape=(
                jax.ShapeDtypeStruct((bp, lp), x.dtype),
                jax.ShapeDtypeStruct((lp, fp), aw_dtype),
            ),
            grid=(lp // tl, fp // tk),
            in_specs=[
                pl.BlockSpec((bp, tk), lambda l, k: (0, k)),
                _w_blockspec((tl, tk), lambda l, k: (l, k), w_buffers),
            ],
            out_specs=(
                pl.BlockSpec((bp, tl), lambda l, k: (0, l)),
                pl.BlockSpec((tl, tk), lambda l, k: (l, k)),
            ),
            scratch_shapes=scratch,
            compiler_params=pltpu.CompilerParams(
                dimension_semantics=("parallel", "arbitrary"),
                vmem_limit_bytes=_VMEM_LIMIT),
        )(xp, self._wp)

        y = y[:B, : self.n_labels]
        if unpad_aw:
            aw = aw[: self.n_labels, : self.n_features]
        return y, aw

    # -- abstract in the reference module --------------------------------------
    def forward(self, x):
        # TODO(synk): forward() is abstract (NotImplementedError) in BaseMFSLayer;
        # subclass-specific forward logic is not defined in the spec.
        raise NotImplementedError("BaseMFSLayer.forward is abstract in the spec")


# ---------------------------------------------------------------------------
# Demo / correctness check
# ---------------------------------------------------------------------------
if __name__ == "__main__":
    # Small shapes, deliberately not 128-multiples, so padding + multi-tile
    # (L, K) grids are exercised.
    batch, n_features, n_labels = 8, 320, 200

    key = jax.random.PRNGKey(0)
    kx, kw = jax.random.split(key)
    x = jax.random.normal(kx, (batch, n_features), dtype=jnp.float32)

    layer = BaseMFSLayerPallas(n_features, n_labels, activation=jax.nn.sigmoid)

    w_ones = jnp.ones((n_labels, n_features), jnp.float32)            # module init state
    w_rand = jax.random.normal(kw, (n_labels, n_features), jnp.float32)

    # HIGHEST precision matches PyTorch's exact-f32 Linear and allows tight
    # tolerances in the check (default precision is used in production calls).
    hi = lax.Precision.HIGHEST

    for w in (w_ones, w_rand):
        layer.set_weight(w)

        y = layer.fs_linear(x, precision=hi)
        y_multi_k = layer.fs_linear(x, precision=hi, tl_max=128, tk_max=128)  # K-accum path
        aw = layer.get_activated_weight()
        aw_x = layer.activation(layer.get_weight())
        y_f, aw_f = layer.fs_linear_and_activated_weight(x, precision=hi)
        jax.block_until_ready((y, y_multi_k, aw, aw_x, y_f, aw_f))

        y_ref = jnp.dot(x, w.T, precision=hi, preferred_element_type=jnp.float32)
        aw_ref = jax.nn.sigmoid(w)

        assert y.shape == (batch, n_labels)
        assert y_f.shape == (batch, n_labels)
        assert aw.shape == (n_labels, n_features)
        assert aw_f.shape == (n_labels, n_features)
        assert jnp.allclose(y, y_ref, rtol=1e-5, atol=1e-4)
        assert jnp.allclose(y_multi_k, y_ref, rtol=1e-5, atol=1e-4)
        assert jnp.allclose(y_f, y_ref, rtol=1e-5, atol=1e-4)
        assert jnp.allclose(aw, aw_ref, rtol=1e-6, atol=1e-6)
        assert jnp.allclose(aw_x, aw_ref, rtol=1e-6, atol=1e-6)
        assert jnp.allclose(aw_f, aw_ref, rtol=1e-6, atol=1e-6)

    print("KERNEL_OK")
</pallas_src>

<mosaic_0001>
module attributes {stable_mosaic.version = 11 : i64} {
  func.func @kernel(%arg0: i32, %arg1: i32, %arg2: i32, %arg3: memref<8x384xf32, #tpu.memory_space<vmem>>, %arg4: memref<128x384xf32, #tpu.memory_space<vmem>>, %arg5: memref<8x128xf32, #tpu.memory_space<vmem>>) attributes {dimension_semantics = [#tpu.dimension_semantics<parallel>, #tpu.dimension_semantics<parallel>, #tpu.dimension_semantics<arbitrary>], iteration_bounds = array<i64: 1, 2, 1>, scalar_prefetch = 0 : i64, scratch_operands = 0 : i64, tpu.core_type = #tpu.core_type<tc>, window_params = [{transform_indices = @transform_0, window_bounds = array<i64: 8, 384>}, {transform_indices = @transform_1, window_bounds = array<i64: 128, 384>}, {transform_indices = @transform_2, window_bounds = array<i64: 8, 128>}]} {
    %c0_i32 = arith.constant 0 : i32
    %0 = arith.cmpi eq, %arg2, %c0_i32 : i32
    %1 = arith.extui %0 : i1 to i32
    %c0_i32_0 = arith.constant 0 : i32
    %2 = arith.cmpi ne, %1, %c0_i32_0 : i32
    scf.if %2 {
      %cst_8 = arith.constant 0.000000e+00 : f32
      %9 = vector.broadcast %cst_8 : f32 to vector<8x128xf32>
      %c0_9 = arith.constant 0 : index
      %c0_10 = arith.constant 0 : index
      %10 = vector.load %arg5[%c0_9, %c0_10] : memref<8x128xf32, #tpu.memory_space<vmem>>, vector<8x128xf32>
      tpu.vector_store %arg5[%c0_9, %c0_10], %9 {strides = array<i32>} : memref<8x128xf32, #tpu.memory_space<vmem>>, vector<8x128xf32>,
    } else {
    }
    %c0 = arith.constant 0 : index
    %c0_1 = arith.constant 0 : index
    %3 = vector.load %arg5[%c0, %c0_1] : memref<8x128xf32, #tpu.memory_space<vmem>>, vector<8x128xf32>
    %c0_2 = arith.constant 0 : index
    %c0_3 = arith.constant 0 : index
    %4 = vector.load %arg3[%c0_2, %c0_3] : memref<8x384xf32, #tpu.memory_space<vmem>>, vector<8x384xf32>
    %c0_4 = arith.constant 0 : index
    %c0_5 = arith.constant 0 : index
    %5 = vector.load %arg4[%c0_4, %c0_5] : memref<128x384xf32, #tpu.memory_space<vmem>>, vector<128x384xf32>
    %cst = arith.constant dense<0.000000e+00> : vector<8x128xf32>
    %6 = tpu.matmul %4, %5, %cst {dimension_numbers = #tpu.dot_dimension_numbers<[1], [1], [0], [0], [0, 0, 1, 0], [], []>, precision = #tpu.contract_precision<fp32>} : vector<8x384xf32>, vector<128x384xf32>, vector<8x128xf32> -> vector<8x128xf32>
    %7 = arith.addf %3, %6 : vector<8x128xf32>
    %c0_6 = arith.constant 0 : index
    %c0_7 = arith.constant 0 : index
    %8 = vector.load %arg5[%c0_6, %c0_7] : memref<8x128xf32, #tpu.memory_space<vmem>>, vector<8x128xf32>
    tpu.vector_store %arg5[%c0_6, %c0_7], %7 {strides = array<i32>} : memref<8x128xf32, #tpu.memory_space<vmem>>, vector<8x128xf32>,
    return
  }
  func.func @transform_0(%arg0: i32, %arg1: i32, %arg2: i32) -> (i32, i32) {
    %c0_i32 = arith.constant 0 : i32
    return %arg0, %arg2 : i32, i32
  }
  func.func @transform_1(%arg0: i32, %arg1: i32, %arg2: i32) -> (i32, i32) {
    %c0_i32 = arith.constant 0 : i32
    return %arg1, %arg2 : i32, i32
  }
  func.func @transform_2(%arg0: i32, %arg1: i32, %arg2: i32) -> (i32, i32) {
    %c0_i32 = arith.constant 0 : i32
    return %arg0, %arg1 : i32, i32
  }
}

</mosaic_0001>

<bundles_post_ra>
// kernel: tpu_custom_call.1
= control target key start
LH: loop header
LB: loop body
LE: loop exit
PB: predicated region body
PF: predicated region fallthrough
CT: control target
= control target key end

     0   :  { %7 = vsyncpa [#allocation3], 0  ;;  %s3793_s0 = inlined_call_operand.hbm [shape: f32[8,384], index: 0, kind: input, shape index: {}]   ;;  %s3794_s1 = inlined_call_operand.hbm [shape: f32[256,384], index: 1, kind: input, shape index: {}]   ;;  %s3795_s2 = inlined_call_operand.hbm [shape: f32[8,256], index: 2, kind: output, shape index: {}]  }
   0x1   :  { %8 = vsyncpa [#allocation6], 0 }
   0x2   :  { %10 = vsyncpa [#allocation6 + $0x1], 0 }
   0x3   :  { %11 = vsyncpa [#allocation4], 0 }
   0x4   :  { %13 = vsyncpa [#allocation4 + $0x1], 0  ;;  %s2810_s9 = smov 0   ;;  %s2812_s10 = smov 0  }
   0x5   :  { %s2814_s11 = smov 0   ;;  %s2816_s12 = smov 0  }
   0x6   :  { %s2818_s13 = smov 0   ;;  %s2820_s14 = smov 0  }
   0x7 LB: > { %s1897_s15 = sadd.s32 4294967295, %s2785_s14   ;;  %s1898_s16 = sadd.s32 4294967294, %s2785_s14   ;;  %s2785_s14 = sphi %s2820_s14, %s19_s14   ;;  %s2781_s13 = sphi %s2818_s13, %s3947_s13   ;;  %s2777_s12 = sphi %s2816_s12, %s3946_s12   ;;  %s2773_s11 = sphi %s2814_s11, %s3945_s11   ;;  %s2769_s10 = sphi %s2812_s10, %s3944_s10   ;;  %s2765_s9 = sphi %s2810_s9, %s3943_s9  }
   0x8   : > { %s75_s17 = sadd.s32 1, %s2773_s11  ;;  %p82_p0 = scmp.ne.s32.totalorder %s2773_s11, %s2769_s10 }
   0x9   : > { %p83_p1 = scmp.eq.s32.totalorder %s2785_s14, 0  ;;  %p88_p2 = scmp.ne.s32.totalorder %s2769_s10, %s2765_s9 }
   0xa   : > { %p2848_p3 = scmp.eq.s32.totalorder %s1897_s15, 0  ;;  %p114_p4 = scmp.eq.s32.totalorder %s1897_s15, 1 }
   0xb   : > { %p2852_p5 = por %p83_p1, %p82_p0  ;;  %p120_p6 = scmp.eq.s32.totalorder %s1898_s16, 1 }
   0xc   : > { %s3854_s18 = scalar_select %p2848_p3, 1, 0 }
   0xd   : > { %p2858_p7 = por %p2848_p3, %p88_p2  ;;  %p2862_p8 = por %p114_p4, %p82_p0 }
   0xe   : > { %p2866_p9 = por %p120_p6, %p88_p2  ;;  %p1899_p10 = scmp.ge.s32.totalorder %s2785_s14, 1 }
   0xf   : > { %s3856_s20 = scalar_select %p2858_p7, 1, 0 }
  0x10   : > { %s3857_s21 = scalar_select %p2862_p8, 1, 0 }
  0x11   : > { %s3858_s22 = scalar_select %p2866_p9, 1, 0 }
  0x12   : > { %p127_p11 = scmp.lt.s32.totalorder %s2785_s14, 3  ;;  %s2787_s24 = smov [#allocation2]  }
  0x13   : > { %s145_s25 = sshll.u32 %s2787_s24, 4  ;;  %p2584_p1 = scmp.lt.s32.totalorder %s2785_s14, 2  ;;  %s146_s25 = int_to_ptr.vmem [resolvable:$true] %s145_s25 }
  0x14   : > { %p2873_p13 = pnand %p1899_p10, %p127_p11  ;;  %s34_s28 = sadd.s32 1, %s2781_s13 }
  0x15   : > { %p2882_p4 = pnand %p2584_p1, %p2852_p5  ;;  %p2893_p6 = scmp.ge.s32.totalorder %s34_s28, 2 }
  0x16   : > { %s3859_s23 = scalar_select %p2873_p13, 1, 0 }
  0x17   : > { %p2571_p0 = pneg %p2873_p13  ;;  %s156_s30 = sand.u32 1, %s2773_s11  }
  0x18   : > { %s3860_s26 = scalar_select %p2882_p4, 1, 0 }
  0x19   : > { %p2888_p2 = pnand %p2571_p0, %p2848_p3  ;;  %s2641_s5 = scalar_lea.hbm %s3793_s0, 384 }
  0x1a   : > { %s3862_s29 = scalar_select %p2893_p6, 1, 0 }
  0x1b   : > { %p2642_p5 = scmp.ne.s32.totalorder %s3793_s0, %s2641_s5  ;;  %p2643_p10 = pneg %p2888_p2 }
  0x1c   : > { %p2648_p0 = scmp.lt.u32.totalorder %s2641_s5, %s3793_s0 }
  0x1d   : > { %p2644_p11 = pnand %p2643_p10, %p2642_p5 }
  0x1f   : > { %p2645_p1 = pneg %p2644_p11 }
  0x21   : > { %p2650_p12 = pnand %p2648_p0, %p2645_p1 }
  0x23   : > { %2653 = shalt.err (!%p2650_p12)
}
  0x24   : > { %s2654_s16 = scalar_lea.vmem %s146_s25, 384  ;;  %p2662_p3 = scmp.lt.s32.totalorder %s146_s25, %s146_s25 }
  0x25   : > { %p2655_p9 = scmp.ne.s32.totalorder %s146_s25, %s2654_s16  ;;  %p2663_p13 = scmp.lt.s32.totalorder %s2654_s16, %s2654_s16 }
  0x27   : > { %p2657_p8 = pnand %p2655_p9, %p2643_p10  ;;  %p2664_p4 = por %p2663_p13, %p2662_p3 }
  0x29   : > { %p2658_p7 = pneg %p2657_p8 }
  0x2b   : > { %p2665_p6 = pnand %p2664_p4, %p2658_p7 }
  0x2d   : > { %2668 = shalt.err (!%p2665_p6)
}
  0x2e   : > { %2574 = dma.hbm_to_vmem [thread:$0]  (!%p2888_p2), %s3793_s0, 384, %s146_s25, [#allocation3]  }
  0x2f   : > { %p3863_p9 = scmp.ne.s32.totalorder %s3862_s29, 0  ;;  %s2560_s3 = smul.u32 384, %s156_s30 }
  0x30   : > { %s2561_s5 = smul.u32 6144, %s2781_s13  ;;  %s2933_s29 = scalar_lea.sflag [#allocation6], %s156_s30 }
  0x31   : > { %s3949_s28 = smov (%p3863_p9, %s34_s28), 0  ;;  %s160_s8 = scalar_lea.vmem [#allocation5], %s2560_s3 }
  0x32   : > { %s70_s4 = ssub.s32 %s2781_s13, %s3949_s28  ;;  %s2924_s7 = scalar_lea.hbm %s3794_s1, %s2561_s5 }
  0x33   : > { %p73_p3 = scmp.eq.s32.totalorder %s70_s4, 0  ;;  %s170_s15 = sshll.u32 %s160_s8, 4  ;;  %s2931_s15 = int_to_ptr.vmem [resolvable:$true] %s170_s15 }
  0x34   : > { %s2669_s16 = scalar_lea.hbm %s2924_s7, 6144  ;;  %p3864_p8 = scmp.ne.s32.totalorder %s3860_s26, 0 }
  0x35   : > { %s2929_s25 = scalar_select %p73_p3, %s2773_s11, %s75_s17  }
  0x36   : > { %p2670_p7 = scmp.ne.s32.totalorder %s2924_s7, %s2669_s16  ;;  %p2671_p12 = pneg %p3864_p8 }
  0x37   : > { %s2674_s3 = scalar_lea.hbm %s3794_s1, 12288  ;;  %p2675_p2 = scmp.lt.u32.totalorder %s2924_s7, %s3794_s1 }
  0x38   : > { %p2672_p13 = pnand %p2671_p12, %p2670_p7  ;;  %p2676_p6 = scmp.lt.u32.totalorder %s2674_s3, %s2669_s16 }
  0x39   : > { %p2678_p10 = scmp.lt.u32.totalorder %s2669_s16, %s2924_s7 }
  0x3a   : > { %p2673_p4 = pneg %p2672_p13  ;;  %p2677_p5 = por %p2676_p6, %p2675_p2 }
  0x3c   : > { %p2679_p11 = por %p2678_p10, %p2677_p5 }
  0x3e   : > { %p2680_p1 = pnand %p2679_p11, %p2673_p4 }
  0x40   : > { %2683 = shalt.err (!%p2680_p1)
}
  0x41   : > { %s2684_s17 = scalar_lea.vmem %s2931_s15, 6144  ;;  %s2788_s30 = smov [#allocation5]  }
  0x42   : > { %p2685_p0 = scmp.ne.s32.totalorder %s2931_s15, %s2684_s17  ;;  %s2689_s27 = sshll.u32 %s2788_s30, 4  ;;  %s2690_s27 = int_to_ptr.vmem [resolvable:$false] %s2689_s27 }
  0x43   : > { %s2691_s6 = scalar_lea.vmem %s2690_s27, 12288  ;;  %p2692_p7 = scmp.lt.s32.totalorder %s2931_s15, %s2690_s27 }
  0x44   : > { %p2687_p9 = pnand %p2685_p0, %p2671_p12  ;;  %p2693_p13 = scmp.lt.s32.totalorder %s2691_s6, %s2684_s17 }
  0x46   : > { %p2688_p3 = pneg %p2687_p9  ;;  %p2694_p2 = por %p2693_p13, %p2692_p7 }
  0x48   : > { %p2695_p6 = pnand %p2694_p2, %p2688_p3 }
  0x4a   : > { %2698 = shalt.err (!%p2695_p6)
}
  0x4b   : > { %s2789_s8 = smov 384   ;;  %s2790_s16 = smov 24  }
  0x4c   : > { %2578 = dma.hbm_to_vmem [thread:$0]  (!%p3864_p8), %s2924_s7, 6144, %s2931_s15, %s2933_s29, %s2789_s8, %s2789_s8, %s2790_s16  }
  0x4d   : > { %p3865_p12 = scmp.ne.s32.totalorder %s3859_s23, 0 }
  0x4f   : > { %182 = sbr.rel (%p3865_p12) target bundleno = 720 (0x2d0), region = 28 }
  0x56   : > { %p3866_p4 = scmp.ne.s32.totalorder %s3854_s18, 0 }
  0x58   : > { %2752 = dma.done.wait (%p3866_p4), [#allocation3], 384  }
  0x59   : > { %2754 = vsyncadd (%p3866_p4), [#allocation3], 4294966912  ;;  %s2968_s19 = sand.u32 1, %s2769_s10   ;;  %p3867_p8 = scmp.ne.s32.totalorder %s3856_s20, 0 }
  0x5a   : > { %s2562_s24 = smul.u32 384, %s2968_s19  ;;  %s189_s3 = scalar_lea.sflag [#allocation6], %s2968_s19 }
  0x5c   : > { %s2972_s4 = scalar_lea.vmem [#allocation5], %s2562_s24 }
  0x5d   : > { %2756 = dma.done.wait (%p3867_p8), %s189_s3, 6144  }
  0x5e   : > { %2758 = vsyncadd (%p3867_p8), %s189_s3, 4294961152  ;;  %v226_v0 = vld [vmem:[%s2972_s4 + $0x8] sm:$0xff]  ;;  %v229_v1 = vld [vmem:[%s2972_s4 + $0x20] sm:$0xff]  ;;  %vm2792_vm0 = vmmov 0   ;;  %s1907_s18 = sshll.u32 %s2968_s19, 3  ;;  %s1909_s20 = sshll.u32 %s2777_s12, 7 }
  0x5f   : > { %v225_v2 = vld [vmem:[%s2972_s4] sm:$0xff]  ;;  %v273_v3 = vand.u32 4294901760, %v226_v0  ;;  %v277_v4 = vand.u32 4294901760, %v229_v1  ;;  %v228_v5 = vld [vmem:[%s2972_s4 + $0x18] sm:$0xff]  ;;  %v235_v8 = vld [vmem:[%s2972_s4 + $0x50] sm:$0xff]  ;;  %s212_s23 = scalar_lea.vmem [#allocation7], %s1907_s18  ;;  %s3744_s29 = scalar_lea.hbm %s3795_s2, %s1909_s20 }
  0x60   : > { %v275_v6 = vand.u32 4294901760, %v225_v2  ;;  %v232_v7 = vld [vmem:[%s2972_s4 + $0x38] sm:$0xff]  ;;  %v279_v9 = vand.u32 4294901760, %v228_v5  ;;  %v285_v11 = vand.u32 4294901760, %v235_v8  ;;  %v231_v12 = vld [vmem:[%s2972_s4 + $0x30] sm:$0xff]  ;;  %v234_v17 = vld [vmem:[%s2972_s4 + $0x48] sm:$0xff] }
  0x61   : > { %v281_v10 = vand.u32 4294901760, %v232_v7  ;;  %v2985_v13 = vpack.c.bf16 %v277_v4, %v273_v3  ;;  %v2989_v15 = vsub.f32 %v226_v0, %v273_v3  ;;  %v2991_v16 = vsub.f32 %v229_v1, %v277_v4  ;;  %v238_v18 = vld [vmem:[%s2972_s4 + $0x68] sm:$0xff]  ;;  %v241_v23 = vld [vmem:[%s2972_s4 + $0x80] sm:$0xff]  ;;  %v240_v41 = vld [vmem:[%s2972_s4 + $0x78] sm:$0xff]  ;;  %s1794_s26 = sshll.u32 %s212_s23, 4  ;;  %s1779_s5 = scalar_lea.sflag [#allocation4], %s2968_s19  ;;  %s3746_s26 = int_to_ptr.vmem [resolvable:$true] %s1794_s26 }
  0x62   : > { %v2987_v14 = vsub.f32 %v225_v2, %v275_v6  ;;  %v2995_v19 = vpack.c.bf16 %v279_v9, %v275_v6  ;;  %v2997_v20 = vsub.f32 %v228_v5, %v279_v9  ;;  %v3005_v24 = vsub.f32 %v235_v8, %v285_v11  ;;  %v237_v40 = vld [vmem:[%s2972_s4 + $0x60] sm:$0xff]  ;;  %v244_v54 = vld [vmem:[%s2972_s4 + $0x98] sm:$0xff]  ;;  %v247_v59 = vld [vmem:[%s2972_s4 + $0xb0] sm:$0xff]  ;;  %s2699_s17 = scalar_lea.vmem %s3746_s26, 128  ;;  %p3940_p10 = scmp.ne.s32.totalorder %s3857_s21, 0 }
  0x63   : > { %v2999_v21 = vpack.c.bf16 %v285_v11, %v281_v10  ;;  %v3001_v22 = vsub.f32 %v232_v7, %v281_v10  ;;  %2225 = vmatprep.subr.bf16.mxu0 %v2985_v13  ;;  %v3823_v25 = vand.u32 4294901760, %v2989_v15  ;;  %v3822_v26 = vand.u32 4294901760, %v2991_v16  ;;  %v243_v63 = vld [vmem:[%s2972_s4 + $0x90] sm:$0xff]  ;;  %v246_v8 = vld [vmem:[%s2972_s4 + $0xa8] sm:$0xff]  ;;  %p2700_p5 = scmp.ne.s32.totalorder %s3746_s26, %s2699_s17  ;;  %s2794_s12 = smov [#allocation7]  }
  0x64   : > { %v283_v27 = vand.u32 4294901760, %v231_v12  ;;  %2227 = vmatpush1.bf16.xpose.msra.mxu0 %v2995_v19  ;;  %v287_v28 = vand.u32 4294901760, %v234_v17  ;;  %v3819_v29 = vand.u32 4294901760, %v2987_v14  ;;  %v3817_v30 = vand.u32 4294901760, %v2997_v20  ;;  %s2703_s30 = sshll.u32 %s2794_s12, 4  ;;  %s2704_s30 = int_to_ptr.vmem [resolvable:$false] %s2703_s30 }
  0x65   : > { %3868 = vst [vmem:[#allocation11_spill] sm:$0xff] %v2999_v21  ;;  %v289_v31 = vand.u32 4294901760, %v238_v18  ;;  %2229 = vmatprep.subr.bf16.mxu0 %v2999_v21  ;;  %v388_v32 = vsub.f32 %v2989_v15, %v3823_v25  ;;  %v400_v33 = vsub.f32 %v2991_v16, %v3822_v26  ;;  %v293_v35 = vand.u32 4294901760, %v241_v23  ;;  %p2701_p11 = pnand %p2700_p5, %p3940_p10  ;;  %s2705_s27 = scalar_lea.vmem %s2704_s30, 256 }
  0x66   : > { %v3019_v34 = vsub.f32 %v231_v12, %v283_v27  ;;  %v3021_v36 = vpack.c.bf16 %v287_v28, %v283_v27  ;;  %v3023_v37 = vsub.f32 %v234_v17, %v287_v28  ;;  %v394_v38 = vsub.f32 %v2987_v14, %v3819_v29  ;;  %v250_v17 = vld [vmem:[%s2972_s4 + $0xc8] sm:$0xff]  ;;  %p2706_p0 = scmp.lt.s32.totalorder %s3746_s26, %s2704_s30  ;;  %p2707_p9 = scmp.lt.s32.totalorder %s2705_s27, %s2699_s17 }
  0x67   : > { %v406_v39 = vsub.f32 %v2997_v20, %v3817_v30  ;;  %v389_v42 = vand.u32 4294901760, %v388_v32  ;;  %v401_v43 = vand.u32 4294901760, %v400_v33  ;;  %v3033_v44 = vpack.c.bf16 %v293_v35, %v289_v31  ;;  %p2702_p1 = pneg %p2701_p11 }
  0x68   : > { %3869 = vst [vmem:[#allocation12_spill] sm:$0xff] %v3021_v36  ;;  %v3035_v45 = vsub.f32 %v238_v18, %v289_v31  ;;  %v395_v46 = vand.u32 4294901760, %v394_v38  ;;  %v3037_v48 = vsub.f32 %v241_v23, %v293_v35  ;;  %v3816_v49 = vand.u32 4294901760, %v3001_v22  ;;  %v253_v31 = vld [vmem:[%s2972_s4 + $0xe0] sm:$0xff]  ;;  %p2708_p3 = por %p2707_p9, %p2706_p0 }
  0x69   : > { %3870 = vst [vmem:[#allocation13_spill] sm:$0xff] %v3033_v44  ;;  %v407_v47 = vand.u32 4294901760, %v406_v39  ;;  %v2256_v50 = vpack.c.bf16 %v401_v43, %v389_v42  ;;  %v3814_v51 = vand.u32 4294901760, %v3005_v24  ;;  %v291_v52 = vand.u32 4294901760, %v237_v40 }
  0x6a   : > { %v295_v53 = vand.u32 4294901760, %v240_v41  ;;  %v412_v56 = vsub.f32 %v3001_v22, %v3816_v49  ;;  %v3813_v57 = vand.u32 4294901760, %v3019_v34  ;;  %v3812_v58 = vand.u32 4294901760, %v3023_v37  ;;  %p2709_p7 = pnand %p2708_p3, %p2702_p1 }
  0x6b   : > { %v2258_v55 = vpack.c.bf16 %v407_v47, %v395_v46  ;;  %2257 = vmatprep.subr.bf16.mxu1 %v2256_v50  ;;  %v424_v60 = vsub.f32 %v3005_v24, %v3814_v51  ;;  %v3051_v61 = vsub.f32 %v237_v40, %v291_v52  ;;  %v297_v3 = vand.u32 4294901760, %v244_v54  ;;  %v3183_v51 = vld [vmem:[%s2972_s4 + $0x158] sm:$0xff] }
  0x6c   : > { %v3053_v62 = vsub.f32 %v240_v41, %v295_v53  ;;  %2231 = vmatpush1.bf16.xpose.msra.mxu0 %v3021_v36  ;;  %v413_v0 = vand.u32 4294901760, %v412_v56  ;;  %v418_v1 = vsub.f32 %v3019_v34, %v3813_v57  ;;  %v430_v2 = vsub.f32 %v3023_v37, %v3812_v58  ;;  %v3100_v56 = vld [vmem:[%s2972_s4 + $0xd8] sm:$0xff] }
  0x6d   : > { %2259 = vmatpush1.bf16.xpose.msra.mxu1 %v2258_v55  ;;  %2233 = vmatprep.subr.bf16.mxu0 %v3033_v44  ;;  %v425_v4 = vand.u32 4294901760, %v424_v60  ;;  %v301_v5 = vand.u32 4294901760, %v247_v59  ;;  %v3811_v6 = vand.u32 4294901760, %v3035_v45  ;;  %v3810_v7 = vand.u32 4294901760, %v3037_v48  ;;  %v3176_v58 = vld [vmem:[%s2972_s4 + $0x138] sm:$0xff] }
  0x6e   : > { %v3067_v9 = vpack.c.bf16 %v295_v53, %v291_v52  ;;  %v419_v10 = vand.u32 4294901760, %v418_v1  ;;  %v431_v11 = vand.u32 4294901760, %v430_v2  ;;  %v299_v12 = vand.u32 4294901760, %v243_v63  ;;  %v3090_v52 = vld [vmem:[%s2972_s4 + $0xc0] sm:$0xff]  ;;  %v256_v1 = vld [vmem:[%s2972_s4 + $0xf8] sm:$0xff] }
  0x6f   : > { %v2260_v18 = vpack.c.bf16 %v425_v4, %v413_v0  ;;  %v3070_v23 = vpack.c.bf16 %v301_v5, %v297_v3  ;;  %v3072_v27 = vsub.f32 %v244_v54, %v297_v3  ;;  %v436_v28 = vsub.f32 %v3035_v45, %v3811_v6 }
  0x70   : > { %3871 = vst [vmem:[#allocation14_spill] sm:$0xff] %v3067_v9  ;;  %v2262_v32 = vpack.c.bf16 %v431_v11, %v419_v10  ;;  %v3078_v33 = vsub.f32 %v247_v59, %v301_v5  ;;  %v448_v35 = vsub.f32 %v3037_v48, %v3810_v7  ;;  %v303_v38 = vand.u32 4294901760, %v246_v8 }
  0x71   : > { %3872 = vst [vmem:[#allocation15_spill] sm:$0xff] %v3070_v23  ;;  %2261 = vmatprep.subr.bf16.mxu1 %v2260_v18  ;;  %v437_v39 = vand.u32 4294901760, %v436_v28  ;;  %v3808_v40 = vand.u32 4294901760, %v3051_v61  ;;  %v3807_v41 = vand.u32 4294901760, %v3053_v62  ;;  %v305_v42 = vand.u32 4294901760, %v250_v17  ;;  %v259_v18 = vld [vmem:[%s2972_s4 + $0x110] sm:$0xff] }
  0x72   : > { %v449_v43 = vand.u32 4294901760, %v448_v35  ;;  %v3085_v46 = vsub.f32 %v243_v63, %v299_v12  ;;  %v3087_v47 = vsub.f32 %v246_v8, %v303_v38  ;;  %v309_v50 = vand.u32 4294901760, %v253_v31 }
  0x73   : > { %v442_v53 = vsub.f32 %v3051_v61, %v3808_v40  ;;  %v454_v54 = vsub.f32 %v3053_v62, %v3807_v41  ;;  %v3805_v55 = vand.u32 4294901760, %v3072_v27  ;;  %v3103_v60 = vsub.f32 %v250_v17, %v305_v42 }
  0x74   : > { %2235 = vmatpush1.bf16.xpose.msra.mxu0 %v3067_v9  ;;  %v2264_v59 = vpack.c.bf16 %v449_v43, %v437_v39  ;;  %v3105_v63 = vsub.f32 %v253_v31, %v309_v50  ;;  %v3802_v0 = vand.u32 4294901760, %v3078_v33  ;;  %v307_v5 = vand.u32 4294901760, %v3090_v52  ;;  %v3126_v39 = vld [vmem:[%s2972_s4 + $0xf0] sm:$0xff] }
  0x75   : > { %2263 = vmatpush1.bf16.xpose.msra.mxu1 %v2262_v32  ;;  %2237 = vmatprep.subr.bf16.mxu0 %v3070_v23  ;;  %v443_v2 = vand.u32 4294901760, %v442_v53  ;;  %v455_v3 = vand.u32 4294901760, %v454_v54  ;;  %v460_v4 = vsub.f32 %v3072_v27, %v3805_v55  ;;  %v311_v10 = vand.u32 4294901760, %v3100_v56 }
  0x76   : > { %2265 = vmatprep.subr.bf16.mxu1 %v2264_v59  ;;  %v472_v8 = vsub.f32 %v3078_v33, %v3802_v0  ;;  %v3803_v11 = vand.u32 4294901760, %v3085_v46  ;;  %v3804_v17 = vand.u32 4294901760, %v3087_v47  ;;  %v3121_v28 = vpack.c.bf16 %v303_v38, %v299_v12 }
  0x77   : > { %v3123_v31 = vpack.c.bf16 %v309_v50, %v305_v42  ;;  %v461_v32 = vand.u32 4294901760, %v460_v4  ;;  %v313_v35 = vand.u32 4294901760, %v256_v1  ;;  %v2266_v43 = vpack.c.bf16 %v455_v3, %v443_v2  ;;  %v258_v50 = vld [vmem:[%s2972_s4 + $0x108] sm:$0xff] }
  0x78   : > { %3873 = vst [vmem:[#allocation16_spill] sm:$0xff] %v3121_v28  ;;  %v473_v53 = vand.u32 4294901760, %v472_v8  ;;  %v3129_v54 = vsub.f32 %v3090_v52, %v307_v5  ;;  %v466_v59 = vsub.f32 %v3085_v46, %v3803_v11  ;;  %v3135_v0 = vsub.f32 %v3100_v56, %v311_v10  ;;  %v262_v4 = vld [vmem:[%s2972_s4 + $0x128] sm:$0xff] }
  0x79   : > { %3874 = vst [vmem:[#allocation17_spill] sm:$0xff] %v3123_v31  ;;  %v478_v12 = vsub.f32 %v3087_v47, %v3804_v17  ;;  %v317_v38 = vand.u32 4294901760, %v259_v18  ;;  %v3806_v42 = vand.u32 4294901760, %v3103_v60  ;;  %v3809_v52 = vand.u32 4294901760, %v3105_v63 }
  0x7a   : > { %v2268_v2 = vpack.c.bf16 %v473_v53, %v461_v32  ;;  %v315_v3 = vand.u32 4294901760, %v3126_v39  ;;  %v467_v8 = vand.u32 4294901760, %v466_v59  ;;  %v3145_v56 = vsub.f32 %v256_v1, %v313_v35 }
  0x7b   : > { %v479_v11 = vand.u32 4294901760, %v478_v12  ;;  %v484_v17 = vsub.f32 %v3103_v60, %v3806_v42  ;;  %v3151_v55 = vsub.f32 %v259_v18, %v317_v38  ;;  %v496_v32 = vsub.f32 %v3105_v63, %v3809_v52  ;;  %v265_v12 = vld [vmem:[%s2972_s4 + $0x140] sm:$0xff] }
  0x7c   : > { %2239 = vmatpush1.bf16.xpose.msra.mxu0 %v3121_v28  ;;  %v319_v53 = vand.u32 4294901760, %v258_v50  ;;  %v3815_v59 = vand.u32 4294901760, %v3129_v54  ;;  %v3818_v42 = vand.u32 4294901760, %v3135_v0  ;;  %v321_v41 = vand.u32 4294901760, %v262_v4 }
  0x7d   : > { %2267 = vmatpush1.bf16.xpose.msra.mxu1 %v2266_v43  ;;  %2241 = vmatprep.subr.bf16.mxu0 %v3123_v31  ;;  %v485_v1 = vand.u32 4294901760, %v484_v17  ;;  %v3161_v43 = vld [vmem:[%s2972_s4 + $0x120] sm:$0xff]  ;;  %v497_v18 = vand.u32 4294901760, %v496_v32  ;;  %v3164_v40 = vsub.f32 %v3126_v39, %v315_v3  ;;  %v3821_v6 = vand.u32 4294901760, %v3145_v56 }
  0x7e   : > { %2269 = vmatprep.subr.bf16.mxu1 %v2268_v2  ;;  %v3166_v52 = vsub.f32 %v258_v50, %v319_v53  ;;  %v490_v7 = vsub.f32 %v3129_v54, %v3815_v59  ;;  %v502_v17 = vsub.f32 %v3135_v0, %v3818_v42  ;;  %v325_v2 = vand.u32 4294901760, %v265_v12 }
  0x7f   : > { %v3178_v32 = vpack.c.bf16 %v311_v10, %v307_v5  ;;  %v2270_v39 = vpack.c.bf16 %v479_v11, %v467_v8  ;;  %v3820_v50 = vand.u32 4294901760, %v3151_v55  ;;  %v3824_v57 = vand.u32 4294901760, %v3161_v43  ;;  %v271_v8 = vld [vmem:[%s2972_s4 + $0x170] sm:$0xff] }
  0x80   : > { %v3185_v59 = vpack.c.bf16 %v317_v38, %v313_v35  ;;  %v2272_v49 = vpack.c.bf16 %v497_v18, %v485_v1  ;;  %v3187_v30 = vsub.f32 %v262_v4, %v321_v41  ;;  %v508_v42 = vsub.f32 %v3145_v56, %v3821_v6  ;;  %v223_v4 = vld [vmem:[#allocation2 + $0x8] sm:$0xff] }
  0x81   : > { %3875 = vst [vmem:[#allocation18_spill] sm:$0xff] %v3178_v32  ;;  %v3192_v29 = vsub.f32 %v265_v12, %v325_v2  ;;  %v520_v5 = vsub.f32 %v3151_v55, %v3820_v50  ;;  %v327_v10 = vand.u32 4294901760, %v3176_v58  ;;  %v3827_v11 = vand.u32 4294901760, %v3164_v40 }
  0x82   : > { %3876 = vst [vmem:[#allocation19_spill] sm:$0xff] %v3185_v59  ;;  %v491_v35 = vand.u32 4294901760, %v490_v7  ;;  %v503_v38 = vand.u32 4294901760, %v502_v17  ;;  %v329_v1 = vand.u32 4294901760, %v3183_v51  ;;  %v509_v12 = vand.u32 4294901760, %v508_v42 }
  0x83   : > { %v521_v18 = vand.u32 4294901760, %v520_v5  ;;  %v3206_v50 = vsub.f32 %v3161_v43, %v3824_v57  ;;  %v3210_v7 = vsub.f32 %v3176_v58, %v327_v10  ;;  %v333_v17 = vand.u32 4294901760, %v271_v8  ;;  %v267_v5 = vld [vmem:[%s2972_s4 + $0x150] sm:$0xff]  ;;  %v270_v57 = vld [vmem:[%s2972_s4 + $0x168] sm:$0xff] }
  0x84   : > { %2243 = vmatpush1.bf16.xpose.msra.mxu0 %v3178_v32  ;;  %v3213_v26 = vpack.c.bf16 %v319_v53, %v315_v3  ;;  %v3215_v25 = vpack.c.bf16 %v325_v2, %v321_v41  ;;  %v514_v42 = vsub.f32 %v3164_v40, %v3827_v11  ;;  %v3880_v58 = vand.u32 4294901760, %v3166_v52 }
  0x85   : > { %2271 = vmatpush1.bf16.xpose.msra.mxu1 %v2270_v39  ;;  %2245 = vmatprep.subr.bf16.mxu0 %v3185_v59  ;;  %3877 = vst [vmem:[#allocation20_spill] sm:$0xff] %v3210_v7  ;;  %v3834_v39 = vand.u32 4294901760, %v3192_v29  ;;  %v3227_v6 = vsub.f32 %v3183_v51, %v329_v1  ;;  %v3229_v3 = vsub.f32 %v271_v8, %v333_v17  ;;  %v3882_v53 = vand.u32 4294901760, %v3187_v30  ;;  %v222_v8 = vld [vmem:[#allocation2] sm:$0xff] }
  0x86   : > { %2273 = vmatprep.subr.bf16.mxu1 %v2272_v49  ;;  %3878 = vst [vmem:[#allocation21_spill] sm:$0xff] %v3213_v26  ;;  %3879 = vst [vmem:[#allocation22_spill] sm:$0xff] %v3215_v25  ;;  %v2274_v49 = vpack.c.bf16 %v503_v38, %v491_v35  ;;  %v526_v59 = vsub.f32 %v3166_v52, %v3880_v58  ;;  %v2276_v41 = vpack.c.bf16 %v521_v18, %v509_v12 }
  0x87   : > { %3881 = vst [vmem:[#allocation23_spill] sm:$0xff] %v3229_v3  ;;  %v532_v2 = vsub.f32 %v3187_v30, %v3882_v53  ;;  %v544_v11 = vsub.f32 %v3192_v29, %v3834_v39  ;;  %v331_v38 = vand.u32 4294901760, %v267_v5  ;;  %v335_v32 = vand.u32 4294901760, %v270_v57 }
  0x88   : > { %v549_v58 = vand.u32 4294901760, %v3210_v7  ;;  %v3239_v31 = vand.u32 4294901760, %v223_v4  ;;  %v515_v51 = vand.u32 4294901760, %v514_v42  ;;  %v527_v28 = vand.u32 4294901760, %v526_v59 }
  0x89   : > { %v555_v18 = vand.u32 4294901760, %v3227_v6  ;;  %v567_v53 = vand.u32 4294901760, %v3229_v3  ;;  %v533_v39 = vand.u32 4294901760, %v532_v2  ;;  %v545_v35 = vand.u32 4294901760, %v544_v11 }
  0x8a   : > { %3883 = vst [vmem:[#allocation24_spill] sm:$0xff] %v3239_v31  ;;  %v3242_v12 = vsub.f32 %v223_v4, %v3239_v31  ;;  %610 = vmatprep.mubr.f32.mxu1 %v3239_v31  ;;  %v3884_v23 = vand.u32 4294901760, %v3206_v50  ;;  %v550_v59 = vsub.f32 %v3210_v7, %v549_v58  ;;  %v3253_v4 = vsub.f32 %v267_v5, %v331_v38 }
  0x8b   : > { %v3255_v9 = vsub.f32 %v270_v57, %v335_v32  ;;  %v3258_v44 = vand.u32 4294901760, %v222_v8  ;;  %v568_v11 = vsub.f32 %v3229_v3, %v567_v53  ;;  %v3885_v2 = vand.u32 4294901760, %v3161_v43 }
  0x8c   : > { %2247 = vmatpush1.bf16.xpose.msra.mxu0 %v3213_v26  ;;  %v538_v42 = vsub.f32 %v3206_v50, %v3884_v23  ;;  %v3853_v31 = vand.u32 4294901760, %v3242_v12  ;;  %v3266_v26 = vpack.c.bf16 %v333_v17, %v329_v1  ;;  %v2278_v57 = vpack.c.bf16 %v527_v28, %v515_v51 }
  0x8d   : > { %2275 = vmatpush1.bf16.xpose.msra.mxu1 %v2274_v49  ;;  %2249 = vmatprep.subr.bf16.mxu0 %v3215_v25  ;;  %v556_v49 = vsub.f32 %v3227_v6, %v555_v18  ;;  %v3264_v23 = vpack.c.bf16 %v327_v10, %v3885_v2  ;;  %v551_v7 = vand.u32 4294901760, %v550_v59  ;;  %v3272_v21 = vsub.f32 %v222_v8, %v3258_v44 }
  0x8e   : > { %2277 = vmatprep.subr.bf16.mxu1 %v2276_v41  ;;  %v372_v5 = vsub.f32 %v3242_v12, %v3853_v31  ;;  %v2280_v41 = vpack.c.bf16 %v545_v35, %v533_v39  ;;  %v539_v25 = vand.u32 4294901760, %v538_v42  ;;  %v561_v3 = vand.u32 4294901760, %v3253_v4 }
  0x8f   : > { %v573_v43 = vand.u32 4294901760, %v3255_v9  ;;  %v557_v10 = vand.u32 4294901760, %v556_v49  ;;  %v569_v2 = vand.u32 4294901760, %v568_v11  ;;  %v3277_v1 = vpack.c.bf16 %v335_v32, %v331_v38 }
  0x90   : > { %v373_v36 = vand.u32 4294901760, %v372_v5  ;;  %v2288_v28 = vpack.c.bf16 %v2991_v16, %v2989_v15  ;;  %v2282_v17 = vpack.c.bf16 %v551_v7, %v539_v25  ;;  %v562_v35 = vsub.f32 %v3253_v4, %v561_v3 }
  0x91   : > { %v574_v51 = vsub.f32 %v3255_v9, %v573_v43  ;;  %v2284_v8 = vpack.c.bf16 %v569_v2, %v557_v10  ;;  %v3887_v42 = vand.u32 4294901760, %v2991_v16  ;;  %v3888_v38 = vand.u32 4294901760, %v2987_v14 }
  0x92   : > { %374 = vmatprep.mubr.f32.mxu0 %v373_v36  ;;  %v3886_v36 = vand.u32 4294901760, %v2989_v15  ;;  %v3889_v59 = vand.u32 4294901760, %v2997_v20  ;;  %v3890_v25 = vand.u32 4294901760, %v3001_v22  ;;  %v3891_v7 = vand.u32 4294901760, %v3005_v24 }
  0x93   : > { %v3892_v5 = vand.u32 4294901760, %v3019_v34  ;;  %v3893_v15 = vand.u32 4294901760, %v3023_v37  ;;  %v3894_v16 = vand.u32 4294901760, %v3035_v45  ;;  %v3896_v2 = vand.u32 4294901760, %v3051_v61 }
  0x94   : > { %2251 = vmatpush1.bf16.xpose.msra.mxu0 %v3264_v23  ;;  %v3289_v32 = vpack.c.bf16 %v3887_v42, %v3886_v36  ;;  %v3295_v49 = vpack.c.bf16 %v3889_v59, %v3888_v38  ;;  %v3301_v11 = vpack.c.bf16 %v3891_v7, %v3890_v25  ;;  %v3897_v36 = vand.u32 4294901760, %v3053_v62 }
  0x95   : > { %2279 = vmatpush1.bf16.xpose.msra.mxu1 %v2278_v57  ;;  %2253 = vmatprep.subr.bf16.mxu0 %v3266_v26  ;;  %v3307_v57 = vpack.c.bf16 %v3893_v15, %v3892_v5  ;;  %v3898_v38 = vand.u32 4294901760, %v3072_v27  ;;  %v3899_v59 = vand.u32 4294901760, %v3078_v33  ;;  %v3901_v7 = vand.u32 4294901760, %v3085_v46 }
  0x96   : > { %2281 = vmatprep.subr.bf16.mxu1 %v2280_v41  ;;  %v3895_v41 = vand.u32 4294901760, %v3037_v48  ;;  %v3319_v42 = vpack.c.bf16 %v3897_v36, %v3896_v2  ;;  %v3902_v5 = vand.u32 4294901760, %v3087_v47  ;;  %v3907_v2 = vand.u32 4294901760, %v3129_v54 }
  0x97   : > { %v3325_v25 = vpack.c.bf16 %v3899_v59, %v3898_v38  ;;  %v3908_v36 = vand.u32 4294901760, %v3135_v0  ;;  %v3910_v38 = vand.u32 4294901760, %v3145_v56  ;;  %v3911_v59 = vand.u32 4294901760, %v3151_v55 }
  0x98   : > { %v3313_v10 = vpack.c.bf16 %v3895_v41, %v3894_v16  ;;  %v3331_v15 = vpack.c.bf16 %v3902_v5, %v3901_v7  ;;  %v3904_v16 = vand.u32 4294901760, %v3103_v60  ;;  %v3905_v41 = vand.u32 4294901760, %v3105_v63 }
  0x99   : > { %3900 = vst [vmem:[#allocation25_spill] sm:$0xff] %v3325_v25  ;;  %v3343_v39 = vpack.c.bf16 %v3908_v36, %v3907_v2  ;;  %v3349_v25 = vpack.c.bf16 %v3911_v59, %v3910_v38  ;;  %v3913_v7 = vand.u32 4294901760, %v3164_v40  ;;  %v3914_v5 = vand.u32 4294901760, %v3166_v52 }
  0x9a   : > { %3903 = vst [vmem:[#allocation26_spill] sm:$0xff] %v3331_v15  ;;  %v3337_v31 = vpack.c.bf16 %v3905_v41, %v3904_v16  ;;  %v3915_v16 = vand.u32 4294901760, %v3187_v30  ;;  %v3916_v41 = vand.u32 4294901760, %v3192_v29  ;;  %v3917_v2 = vand.u32 4294901760, %v3206_v50 }
  0x9b   : > { %3909 = vst [vmem:[#allocation28_spill] sm:$0xff] %v3343_v39  ;;  %3912 = vst [vmem:[#allocation29_spill] sm:$0xff] %v3349_v25  ;;  %v3355_v15 = vpack.c.bf16 %v3914_v5, %v3913_v7  ;;  %v3367_v39 = vpack.c.bf16 %v567_v53, %v555_v18  ;;  %v3369_v38 = vpack.c.bf16 %v573_v43, %v561_v3  ;;  %v3918_v59 = vand.u32 4294901760, %v3272_v21 }
  0x9c   : > { %3906 = vst [vmem:[#allocation27_spill] sm:$0xff] %v3337_v31  ;;  %v3361_v31 = vpack.c.bf16 %v3916_v41, %v3915_v16  ;;  %v3365_v36 = vpack.c.bf16 %v549_v58, %v3917_v2  ;;  %2255 = vmatpush1.bf16.xpose.msra.mxu0 %v3277_v1  ;;  %v563_v7 = vand.u32 4294901760, %v562_v35  ;;  %v575_v5 = vand.u32 4294901760, %v574_v51 }
  0x9d   : > { %v378_v25 = vsub.f32 %v3272_v21, %v3918_v59  ;;  %2283 = vmatpush1.bf16.xpose.msra.mxu1 %v2282_v17  ;;  %2289 = vmatprep.subr.bf16.mxu0 %v2288_v28  ;;  %v2290_v58 = vpack.c.bf16 %v2997_v20, %v2987_v14  ;;  %v2292_v3 = vpack.c.bf16 %v3005_v24, %v3001_v22  ;;  %v3919_v14 = vld [vmem:[#allocation11_spill] sm:$0xff]  ;;  %v3920_v20 = vand.u32 4294901760, %v3242_v12  ;;  %v3931_v28 = vld [vmem:[#allocation21_spill] sm:$0xff] }
  0x9e   : > { %2285 = vmatprep.subr.bf16.mxu1 %v2284_v8  ;;  %v2286_v41 = vpack.c.bf16 %v575_v5, %v563_v7  ;;  %v2294_v18 = vpack.c.bf16 %v3023_v37, %v3019_v34  ;;  %v2296_v53 = vpack.c.bf16 %v3037_v48, %v3035_v45  ;;  %v2298_v22 = vpack.c.bf16 %v3053_v62, %v3051_v61  ;;  %v3921_v34 = vld [vmem:[#allocation12_spill] sm:$0xff]  ;;  %v3922_v37 = vld [vmem:[#allocation13_spill] sm:$0xff]  ;;  %v3924_v61 = vld [vmem:[#allocation15_spill] sm:$0xff] }
  0x9f   : > { %v379_v16 = vand.u32 4294901760, %v378_v25  ;;  %v2300_v24 = vpack.c.bf16 %v3078_v33, %v3072_v27  ;;  %v2302_v45 = vpack.c.bf16 %v3087_v47, %v3085_v46  ;;  %v2304_v48 = vpack.c.bf16 %v3105_v63, %v3103_v60  ;;  %v3925_v33 = vld [vmem:[#allocation16_spill] sm:$0xff]  ;;  %v3926_v46 = vld [vmem:[#allocation17_spill] sm:$0xff]  ;;  %v3927_v63 = vld [vmem:[#allocation18_spill] sm:$0xff] }
  0xa0   : > { %v2306_v62 = vpack.c.bf16 %v3135_v0, %v3129_v54  ;;  %v2308_v27 = vpack.c.bf16 %v3151_v55, %v3145_v56  ;;  %v2310_v47 = vpack.c.bf16 %v3166_v52, %v3164_v40  ;;  %v2312_v60 = vpack.c.bf16 %v3192_v29, %v3187_v30  ;;  %v3928_v0 = vld [vmem:[#allocation19_spill] sm:$0xff]  ;;  %v3929_v55 = vld [vmem:[#allocation20_spill] sm:$0xff]  ;;  %v3932_v40 = vld [vmem:[#allocation22_spill] sm:$0xff] }
  0xa1   : > { %v2314_v54 = vpack.c.bf16 %v3929_v55, %v3206_v50  ;;  %v3930_v56 = vld [vmem:[#allocation23_spill] sm:$0xff]  ;;  %v2318_v29 = vpack.c.bf16 %v3255_v9, %v3253_v4  ;;  %v3933_v30 = vld [vmem:[#allocation24_spill] sm:$0xff]  ;;  %v230_v4 = vld [vmem:[%s2972_s4 + $0x28] sm:$0xff] }
  0xa2   : > { %v2316_v43 = vpack.c.bf16 %v3930_v56, %v3227_v6  ;;  %v3934_v6 = vmov %v3918_v59  ;;  %v3938_v9 = vld [vmem:[#allocation28_spill] sm:$0xff]  ;;  %v3939_v52 = vld [vmem:[#allocation29_spill] sm:$0xff]  ;;  %v227_v50 = vld [vmem:[%s2972_s4 + $0x10] sm:$0xff]  ;;  %v1139_v35 = vand.u32 4294901760, %v230_v4 }
  0xa3   : > { %380 = vmatmul.mubr.f32.vlgmr.msra.gmra.mrb[0].mxu0 %v379_v16  ;;  %v1136_v17 = vand.u32 4294901760, %v227_v50 }
  0xa4   : > { %2291 = vmatpush1.bf16.xpose.msra.mxu0 %v2290_v58  ;;  %747 = vmatprep.mubr.f32.mxu0 %v3242_v12  ;;  %v3923_v12 = vld [vmem:[#allocation14_spill] sm:$0xff]  ;;  %v3462_v8 = vsub.f32 %v230_v4, %v1139_v35  ;;  %v2793_v58 = vmov 0.0  }
  0xa5   : > { %2287 = vmatpush1.bf16.xpose.msra.mxu1 %v2286_v41  ;;  %2293 = vmatprep.subr.bf16.mxu0 %v2292_v3  ;;  %v3460_v51 = vsub.f32 %v227_v50, %v1136_v17 }
  0xa6   : > { %2321 = vmatprep.subr.bf16.mxu1 %v2985_v13 }
  0xac   : > { %612 = vmatmul.mubr.f32.vlgmr.msra.gmra.mrb[0].mxu1 %v3258_v44  ;;  %2295 = vmatpush1.bf16.xpose.msra.mxu0 %v2294_v18 }
  0xad   : > { %2323 = vmatpush1.bf16.xpose.msra.mxu1 %v2995_v19  ;;  %2297 = vmatprep.subr.bf16.mxu0 %v2296_v53 }
  0xae   : > { %2325 = vmatprep.subr.bf16.mxu1 %v3919_v14  ;;  %854 = vmatprep.mubr.f32.mxu1 %v3920_v20 }
  0xb4   : > { %2299 = vmatpush1.bf16.xpose.msra.mxu0 %v2298_v22  ;;  %v245_v22 = vld [vmem:[%s2972_s4 + $0xa0] sm:$0xff] }
  0xb5   : > { %2327 = vmatpush1.bf16.xpose.msra.mxu1 %v3921_v34  ;;  %2301 = vmatprep.subr.bf16.mxu0 %v2300_v24  ;;  %v248_v24 = vld [vmem:[%s2972_s4 + $0xb8] sm:$0xff] }
  0xb6   : > { %2329 = vmatprep.subr.bf16.mxu1 %v3922_v37 }
  0xbc   : > { %2303 = vmatpush1.bf16.xpose.msra.mxu0 %v2302_v45 }
  0xbd   : > { %2331 = vmatpush1.bf16.xpose.msra.mxu1 %v3923_v12  ;;  %2305 = vmatprep.subr.bf16.mxu0 %v2304_v48 }
  0xbe   : > { %2333 = vmatprep.subr.bf16.mxu1 %v3924_v61 }
  0xc4   : > { %2307 = vmatpush1.bf16.xpose.msra.mxu0 %v2306_v62 }
  0xc5   : > { %2335 = vmatpush1.bf16.xpose.msra.mxu1 %v3925_v33  ;;  %2309 = vmatprep.subr.bf16.mxu0 %v2308_v27 }
  0xc6   : > { %2337 = vmatprep.subr.bf16.mxu1 %v3926_v46 }
  0xcc   : > { %2311 = vmatpush1.bf16.xpose.msra.mxu0 %v2310_v47 }
  0xcd   : > { %2339 = vmatpush1.bf16.xpose.msra.mxu1 %v3927_v63  ;;  %2313 = vmatprep.subr.bf16.mxu0 %v2312_v60  ;;  %v251_v60 = vld [vmem:[%s2972_s4 + $0xd0] sm:$0xff] }
  0xce   : > { %2341 = vmatprep.subr.bf16.mxu1 %v3928_v0 }
  0xd4   : > { %2315 = vmatpush1.bf16.xpose.msra.mxu0 %v2314_v54  ;;  %v1160_v54 = vand.u32 4294901760, %v251_v60 }
  0xd5   : > { %2343 = vmatpush1.bf16.xpose.msra.mxu1 %v3931_v28  ;;  %2317 = vmatprep.subr.bf16.mxu0 %v2316_v43 }
  0xd6   : > { %2345 = vmatprep.subr.bf16.mxu1 %v3932_v40 }
  0xdc   : > { %2319 = vmatpush1.bf16.xpose.msra.mxu0 %v2318_v29 }
  0xdd   : > { %2347 = vmatpush1.bf16.xpose.msra.mxu1 %v3264_v23  ;;  %2353 = vmatprep.subr.bf16.mxu0 %v3289_v32  ;;  %v233_v32 = vld [vmem:[%s2972_s4 + $0x40] sm:$0xff] }
  0xde   : > { %2349 = vmatprep.subr.bf16.mxu1 %v3266_v26 }
  0xe3   : > { %750 = vmatmul.mubr.f32.vlgmr.msra.gmra.mrb[2].mxu0 %v3272_v21  ;;  %v3936_v21 = vld [vmem:[#allocation26_spill] sm:$0xff] }
  0xe4   : > { %2355 = vmatpush1.bf16.xpose.msra.mxu0 %v3295_v49  ;;  %1024 = vmatprep.mubr.f32.mxu0 %v3933_v30  ;;  %v1142_v49 = vand.u32 4294901760, %v233_v32 }
  0xe5   : > { %2351 = vmatpush1.bf16.xpose.msra.mxu1 %v3277_v1  ;;  %2357 = vmatprep.subr.bf16.mxu0 %v3301_v11 }
  0xe6   : > { %2385 = vmatprep.subr.bf16.mxu1 %v2985_v13  ;;  %v3935_v13 = vld [vmem:[#allocation25_spill] sm:$0xff]  ;;  %v3474_v25 = vsub.f32 %v233_v32, %v1142_v49 }
  0xe8   : > { %v1243_v16 = vand.u32 4294901760, %v3474_v25 }
  0xec   : > { %858 = vmatmul.mubr.f32.vlgmr.msra.gmra.mrb[2].mxu1 %v3934_v6  ;;  %2359 = vmatpush1.bf16.xpose.msra.mxu0 %v3307_v57  ;;  %v1229_v57 = vand.u32 4294901760, %v3460_v51 }
  0xed   : > { %2387 = vmatpush1.bf16.xpose.msra.mxu1 %v2995_v19  ;;  %2361 = vmatprep.subr.bf16.mxu0 %v3313_v10  ;;  %v3937_v19 = vld [vmem:[#allocation27_spill] sm:$0xff]  ;;  %v2791_v10 = vmov 0.0|0.0  }
  0xee   : > { %2389 = vmatprep.subr.bf16.mxu1 %v3919_v14  ;;  %1128 = vmatprep.mubr.f32.mxu1 %v3933_v30  ;;  %v1244_v14 = vsub.f32 %v3474_v25, %v1243_v16  ;;  %v3538_v30 = vsub.f32 %v251_v60, %v1160_v54 }
  0xf0   : > { %v1245_v45 = vand.u32 4294901760, %v1244_v14 }
  0xf4   : > { %2363 = vmatpush1.bf16.xpose.msra.mxu0 %v3319_v42  ;;  %v3472_v42 = vpack.c.bf16 %v1139_v35, %v1136_v17  ;;  %v1285_v35 = vand.u32 4294901760, %v3538_v30 }
  0xf5   : > { %2391 = vmatpush1.bf16.xpose.msra.mxu1 %v3921_v34  ;;  %2365 = vmatprep.subr.bf16.mxu0 %v3935_v13 }
  0xf6   : > { %2393 = vmatprep.subr.bf16.mxu1 %v3922_v37 }
  0xfc   : > { %2367 = vmatpush1.bf16.xpose.msra.mxu0 %v3936_v21 }
  0xfd   : > { %2395 = vmatpush1.bf16.xpose.msra.mxu1 %v3923_v12  ;;  %2369 = vmatprep.subr.bf16.mxu0 %v3937_v19  ;;  %v1154_v12 = vand.u32 4294901760, %v245_v22  ;;  %v257_v19 = vld [vmem:[%s2972_s4 + $0x100] sm:$0xff] }
  0xfe   : > { %2397 = vmatprep.subr.bf16.mxu1 %v3924_v61  ;;  %v1157_v61 = vand.u32 4294901760, %v248_v24 }
 0x100   : > { %v3527_v47 = vsub.f32 %v248_v24, %v1157_v61 }
 0x104   : > { %2371 = vmatpush1.bf16.xpose.msra.mxu0 %v3938_v9  ;;  %v260_v9 = vld [vmem:[%s2972_s4 + $0x118] sm:$0xff] }
 0x105   : > { %2399 = vmatpush1.bf16.xpose.msra.mxu1 %v3925_v33  ;;  %2373 = vmatprep.subr.bf16.mxu0 %v3939_v52  ;;  %v1166_v52 = vand.u32 4294901760, %v257_v19  ;;  %v1169_v50 = vand.u32 4294901760, %v260_v9 }
 0x106   : > { %2401 = vmatprep.subr.bf16.mxu1 %v3926_v46  ;;  %v3525_v46 = vsub.f32 %v245_v22, %v1154_v12 }
 0x108   : > { %v1271_v43 = vand.u32 4294901760, %v3525_v46 }
 0x10a   : > { %v1272_v13 = vsub.f32 %v3525_v46, %v1271_v43 }
 0x10c   : > { %2375 = vmatpush1.bf16.xpose.msra.mxu0 %v3355_v15  ;;  %v1273_v4 = vand.u32 4294901760, %v1272_v13 }
 0x10d   : > { %2403 = vmatpush1.bf16.xpose.msra.mxu1 %v3927_v63  ;;  %2377 = vmatprep.subr.bf16.mxu0 %v3361_v31  ;;  %v236_v31 = vld [vmem:[%s2972_s4 + $0x58] sm:$0xff]  ;;  %v254_v63 = vld [vmem:[%s2972_s4 + $0xe8] sm:$0xff] }
 0x10e   : > { %2405 = vmatprep.subr.bf16.mxu1 %v3928_v0  ;;  %v1145_v11 = vand.u32 4294901760, %v236_v31  ;;  %v1163_v56 = vand.u32 4294901760, %v254_v63 }
 0x110   : > { %v3476_v15 = vsub.f32 %v236_v31, %v1145_v11  ;;  %v3499_v18 = vpack.c.bf16 %v1145_v11, %v1142_v49  ;;  %v3540_v6 = vsub.f32 %v254_v63, %v1163_v56  ;;  %v3555_v31 = vsub.f32 %v257_v19, %v1166_v52 }
 0x111   : > { %v3557_v49 = vsub.f32 %v260_v9, %v1169_v50  ;;  %v3559_v11 = vpack.c.bf16 %v1163_v56, %v1160_v54  ;;  %v224_v56 = vld [vmem:[#allocation2 + $0x10] sm:$0xff] }
 0x112   : > { %v1250_v41 = vand.u32 4294901760, %v3476_v15  ;;  %v1292_v32 = vand.u32 4294901760, %v3540_v6 }
 0x114   : > { %2379 = vmatpush1.bf16.xpose.msra.mxu0 %v3365_v36  ;;  %v239_v36 = vld [vmem:[%s2972_s4 + $0x70] sm:$0xff]  ;;  %v1251_v20 = vsub.f32 %v3476_v15, %v1250_v41 }
 0x115   : > { %2407 = vmatpush1.bf16.xpose.msra.mxu1 %v3931_v28  ;;  %2381 = vmatprep.subr.bf16.mxu0 %v3367_v39  ;;  %v1236_v39 = vand.u32 4294901760, %v3462_v8  ;;  %v1278_v28 = vand.u32 4294901760, %v3527_v47 }
 0x116   : > { %2409 = vmatprep.subr.bf16.mxu1 %v3932_v40  ;;  %v1252_v48 = vand.u32 4294901760, %v1251_v20  ;;  %v3536_v40 = vpack.c.bf16 %v1157_v61, %v1154_v12 }
 0x117   : > { %v1237_v2 = vsub.f32 %v3462_v8, %v1236_v39  ;;  %v1279_v21 = vsub.f32 %v3527_v47, %v1278_v28 }
 0x118   : > { %v2444_v33 = vpack.c.bf16 %v1252_v48, %v1245_v45  ;;  %v3580_v45 = vpack.c.bf16 %v1169_v50, %v1166_v52 }
 0x119   : > { %v1238_v5 = vand.u32 4294901760, %v1237_v2  ;;  %v1280_v17 = vand.u32 4294901760, %v1279_v21  ;;  %v1286_v2 = vsub.f32 %v3538_v30, %v1285_v35  ;;  %v3595_v21 = vand.u32 4294901760, %v224_v56 }
 0x11c   : > { %2383 = vmatpush1.bf16.xpose.msra.mxu0 %v3369_v38  ;;  %v242_v38 = vld [vmem:[%s2972_s4 + $0x88] sm:$0xff] }
 0x11d   : > { %2411 = vmatpush1.bf16.xpose.msra.mxu1 %v3264_v23  ;;  %2416 = vmatprep.subr.bf16.mxu0 %v2791_v10  ;;  %v1230_v23 = vsub.f32 %v3460_v51, %v1229_v57  ;;  %v1151_v59 = vand.u32 4294901760, %v242_v38 }
 0x11e   : > { %2413 = vmatprep.subr.bf16.mxu1 %v3266_v26  ;;  %v1148_v26 = vand.u32 4294901760, %v239_v36 }
 0x11f   : > { %v1231_v7 = vand.u32 4294901760, %v1230_v23  ;;  %v3497_v3 = vsub.f32 %v242_v38, %v1151_v59  ;;  %v2450_v23 = vpack.c.bf16 %v1280_v17, %v1273_v4  ;;  %v263_v38 = vld [vmem:[%s2972_s4 + $0x130] sm:$0xff]  ;;  %v3608_v4 = vsub.f32 %v224_v56, %v3595_v21 }
 0x120   : > { %v3523_v27 = vpack.c.bf16 %v1151_v59, %v1148_v26  ;;  %v1299_v59 = vand.u32 4294901760, %v3555_v31  ;;  %v1172_v14 = vand.u32 4294901760, %v263_v38  ;;  %v2474_v56 = vpack.c.bf16 %v3527_v47, %v3525_v46 }
 0x121   : > { %v2441_v53 = vpack.c.bf16 %v1238_v5, %v1231_v7  ;;  %v1264_v37 = vand.u32 4294901760, %v3497_v3  ;;  %v1306_v7 = vand.u32 4294901760, %v3557_v49  ;;  %v1287_v5 = vand.u32 4294901760, %v1286_v2 }
 0x122   : > { %v1300_v22 = vsub.f32 %v3555_v31, %v1299_v59  ;;  %v3582_v12 = vsub.f32 %v263_v38, %v1172_v14  ;;  %v1218_v38 = vand.u32 4294901760, %v3608_v4 }
 0x123   : > { %1026 = vmatmul.mubr.f32.vlgmr.msra.gmra.mrb[4].mxu0 %v3258_v44  ;;  %v1265_v62 = vsub.f32 %v3497_v3, %v1264_v37  ;;  %v1307_v24 = vsub.f32 %v3557_v49, %v1306_v7 }
 0x124   : > { %2418 = vmatpush3.bf16.xpose.msra.mxu0 %v3472_v42  ;;  %2046 = vmatprep.mubr.msk.f32.mxu0 %vm2792_vm0, %v2793_v58 }
 0x125   : > { %2415 = vmatpush1.bf16.xpose.msra.mxu1 %v3277_v1  ;;  %2419 = vmatprep.subr.bf16.mxu0 %v2791_v10  ;;  %v3495_v1 = vsub.f32 %v239_v36, %v1148_v26  ;;  %v1266_v55 = vand.u32 4294901760, %v1265_v62  ;;  %v1293_v36 = vsub.f32 %v3540_v6, %v1292_v32  ;;  %v266_v26 = vld [vmem:[%s2972_s4 + $0x148] sm:$0xff]  ;;  %v272_v62 = vld [vmem:[%s2972_s4 + $0x178] sm:$0xff]  ;;  %v1308_v60 = vand.u32 4294901760, %v1307_v24 }
 0x126   : > { %2440 = vmatprep.subr.bf16.mxu1 %v2791_v10  ;;  %v1175_v20 = vand.u32 4294901760, %v266_v26 }
 0x127   : > { %v1257_v34 = vand.u32 4294901760, %v3495_v1 }
 0x128   : > { %v3584_v61 = vsub.f32 %v266_v26, %v1175_v20 }
 0x12a   : > { %v1320_v54 = vand.u32 4294901760, %v3584_v61 }
 0x12c   : > { %1130 = vmatmul.mubr.f32.vlgmr.msra.gmra.mrb[4].mxu1 %v3258_v44  ;;  %2421 = vmatpush3.bf16.xpose.msra.mxu0 %v3499_v18  ;;  %v1258_v44 = vsub.f32 %v3495_v1, %v1257_v34  ;;  %v1321_v50 = vsub.f32 %v3584_v61, %v1320_v54 }
 0x12d   : > { %2442 = vmatpush3.bf16.xpose.msra.mxu1 %v2441_v53  ;;  %2422 = vmatprep.subr.bf16.mxu0 %v2791_v10  ;;  %v1294_v53 = vand.u32 4294901760, %v1293_v36 }
 0x12e   : > { %2443 = vmatprep.subr.bf16.mxu1 %v2791_v10  ;;  %2081 = vmatprep.mubr.msk.f32.mxu1 %vm2792_vm0, %v2793_v58  ;;  %v1259_v0 = vand.u32 4294901760, %v1258_v44  ;;  %v269_v44 = vld [vmem:[%s2972_s4 + $0x160] sm:$0xff] }
 0x12f   : > { %v2453_v48 = vpack.c.bf16 %v1294_v53, %v1287_v5  ;;  %v1178_v63 = vand.u32 4294901760, %v269_v44 }
 0x130   : > { %v2447_v29 = vpack.c.bf16 %v1266_v55, %v1259_v0  ;;  %v1181_v0 = vand.u32 4294901760, %v272_v62  ;;  %v1313_v55 = vand.u32 4294901760, %v3582_v12 }
 0x131   : > { %v3597_v19 = vsub.f32 %v269_v44, %v1178_v63 }
 0x132   : > { %v3599_v9 = vsub.f32 %v272_v62, %v1181_v0  ;;  %v1314_v52 = vsub.f32 %v3582_v12, %v1313_v55  ;;  %v3616_v26 = vpack.c.bf16 %v1181_v0, %v1178_v63  ;;  %v2465_v62 = vpack.c.bf16 %v3462_v8, %v3460_v51 }
 0x133   : > { %v1327_v2 = vand.u32 4294901760, %v3597_v19  ;;  %v2516_v51 = vpack.c.bf16 %v1250_v41, %v1243_v16  ;;  %v2519_v8 = vpack.c.bf16 %v1264_v37, %v1257_v34 }
 0x134   : > { %2424 = vmatpush3.bf16.xpose.msra.mxu0 %v3523_v27  ;;  %v1315_v17 = vand.u32 4294901760, %v1314_v52  ;;  %v1334_v36 = vand.u32 4294901760, %v3599_v9 }
 0x135   : > { %2445 = vmatpush3.bf16.xpose.msra.mxu1 %v2444_v33  ;;  %2425 = vmatprep.subr.bf16.mxu0 %v2791_v10  ;;  %v1301_v33 = vand.u32 4294901760, %v1300_v22  ;;  %v1328_v53 = vsub.f32 %v3597_v19, %v1327_v2 }
 0x136   : > { %2446 = vmatprep.subr.bf16.mxu1 %v2791_v10 }
 0x137   : > { %v2456_v13 = vpack.c.bf16 %v1308_v60, %v1301_v33  ;;  %v1329_v22 = vand.u32 4294901760, %v1328_v53  ;;  %v2468_v33 = vpack.c.bf16 %v3476_v15, %v3474_v25  ;;  %v2471_v60 = vpack.c.bf16 %v3497_v3, %v3495_v1 }
 0x138   : > { %v2486_v53 = vpack.c.bf16 %v3599_v9, %v3597_v19  ;;  %v2522_v25 = vpack.c.bf16 %v1278_v28, %v1271_v43  ;;  %v2528_v1 = vpack.c.bf16 %v1306_v7, %v1299_v59  ;;  %v2531_v3 = vpack.c.bf16 %v1320_v54, %v1313_v55 }
 0x13c   : > { %2427 = vmatpush3.bf16.xpose.msra.mxu0 %v3536_v40 }
 0x13d   : > { %2448 = vmatpush3.bf16.xpose.msra.mxu1 %v2447_v29  ;;  %2428 = vmatprep.subr.bf16.mxu0 %v2791_v10  ;;  %v3593_v29 = vpack.c.bf16 %v1175_v20, %v1172_v14  ;;  %v1335_v14 = vsub.f32 %v3599_v9, %v1334_v36  ;;  %v1219_v20 = vsub.f32 %v3608_v4, %v1218_v38 }
 0x13e   : > { %2449 = vmatprep.subr.bf16.mxu1 %v2791_v10 }
 0x13f   : > { %v1336_v24 = vand.u32 4294901760, %v1335_v14  ;;  %v2513_v14 = vpack.c.bf16 %v1236_v39, %v1229_v57 }
 0x141   : > { %v2462_v44 = vpack.c.bf16 %v1336_v24, %v1329_v22 }
 0x144   : > { %2430 = vmatpush3.bf16.xpose.msra.mxu0 %v3559_v11 }
 0x145   : > { %2451 = vmatpush3.bf16.xpose.msra.mxu1 %v2450_v23  ;;  %2431 = vmatprep.subr.bf16.mxu0 %v2791_v10  ;;  %v1322_v23 = vand.u32 4294901760, %v1321_v50 }
 0x146   : > { %2452 = vmatprep.subr.bf16.mxu1 %v2791_v10 }
 0x147   : > { %v2459_v5 = vpack.c.bf16 %v1322_v23, %v1315_v17  ;;  %v2477_v17 = vpack.c.bf16 %v3540_v6, %v3538_v30  ;;  %v2480_v23 = vpack.c.bf16 %v3557_v49, %v3555_v31 }
 0x14c   : > { %2433 = vmatpush3.bf16.xpose.msra.mxu0 %v3580_v45 }
 0x14d   : > { %2454 = vmatpush3.bf16.xpose.msra.mxu1 %v2453_v48  ;;  %2434 = vmatprep.subr.bf16.mxu0 %v2791_v10  ;;  %v1220_v48 = vand.u32 4294901760, %v1219_v20 }
 0x14e   : > { %2455 = vmatprep.subr.bf16.mxu1 %v2791_v10 }
 0x154   : > { %2436 = vmatpush3.bf16.xpose.msra.mxu0 %v3593_v29 }
 0x155   : > { %2457 = vmatpush3.bf16.xpose.msra.mxu1 %v2456_v13  ;;  %2437 = vmatprep.subr.bf16.mxu0 %v2791_v10 }
 0x156   : > { %2458 = vmatprep.subr.bf16.mxu1 %v2791_v10 }
 0x15c   : > { %2439 = vmatpush3.bf16.xpose.msra.mxu0 %v3616_v26 }
 0x15d   : > { %2460 = vmatpush3.bf16.xpose.msra.mxu1 %v2459_v5  ;;  %2464 = vmatprep.subr.bf16.mxu0 %v2791_v10  ;;  %v2483_v5 = vpack.c.bf16 %v3584_v61, %v3582_v12 }
 0x15e   : > { %2461 = vmatprep.subr.bf16.mxu1 %v2791_v10 }
 0x163   : > { %2047 = vmatmul.mubr.f32.vlgmr.msra.gmra.mrb[6].mxu0 %v1220_v48 }
 0x164   : > { %2466 = vmatpush3.bf16.xpose.msra.mxu0 %v2465_v62  ;;  %2116 = vmatprep.mubr.msk.f32.mxu0 %vm2792_vm0, %v2793_v58 }
 0x165   : > { %2463 = vmatpush3.bf16.xpose.msra.mxu1 %v2462_v44  ;;  %2467 = vmatprep.subr.bf16.mxu0 %v2791_v10 }
 0x166   : > { %2488 = vmatprep.subr.bf16.mxu1 %v2791_v10 }
 0x16c   : > { %2082 = vmatmul.mubr.f32.vlgmr.msra.gmra.mrb[6].mxu1 %v3595_v21  ;;  %2469 = vmatpush3.bf16.xpose.msra.mxu0 %v2468_v33 }
 0x16d   : > { %2490 = vmatpush3.bf16.xpose.msra.mxu1 %v3472_v42  ;;  %2470 = vmatprep.subr.bf16.mxu0 %v2791_v10 }
 0x16e   : > { %2491 = vmatprep.subr.bf16.mxu1 %v2791_v10  ;;  %2151 = vmatprep.mubr.msk.f32.mxu1 %vm2792_vm0, %v2793_v58 }
 0x174   : > { %2472 = vmatpush3.bf16.xpose.msra.mxu0 %v2471_v60 }
 0x175   : > { %2493 = vmatpush3.bf16.xpose.msra.mxu1 %v3499_v18  ;;  %2473 = vmatprep.subr.bf16.mxu0 %v2791_v10 }
 0x176   : > { %2494 = vmatprep.subr.bf16.mxu1 %v2791_v10  ;;  %v381_v63 = vpop.f32.mrb[0].mxu0 }
 0x177   : > { %v383_v0 = vpop.f32.mrb[1].mxu0 }
 0x17c   : > { %2475 = vmatpush3.bf16.xpose.msra.mxu0 %v2474_v56 }
 0x17d   : > { %2496 = vmatpush3.bf16.xpose.msra.mxu1 %v3523_v27  ;;  %2476 = vmatprep.subr.bf16.mxu0 %v2791_v10 }
 0x17e   : > { %2497 = vmatprep.subr.bf16.mxu1 %v2791_v10 }
 0x17f   : > { %v613_v13 = vpop.f32.mrb[0].mxu1 }
 0x180   : > { %v614_v52 = vadd.f32 %v613_v13, %v381_v63  ;;  %v615_v50 = vpop.f32.mrb[1].mxu1 }
 0x184   : > { %2478 = vmatpush3.bf16.xpose.msra.mxu0 %v2477_v17 }
 0x185   : > { %2499 = vmatpush3.bf16.xpose.msra.mxu1 %v3536_v40  ;;  %2479 = vmatprep.subr.bf16.mxu0 %v2791_v10 }
 0x186   : > { %2500 = vmatprep.subr.bf16.mxu1 %v2791_v10 }
 0x18c   : > { %2481 = vmatpush3.bf16.xpose.msra.mxu0 %v2480_v23 }
 0x18d   : > { %2502 = vmatpush3.bf16.xpose.msra.mxu1 %v3559_v11  ;;  %2482 = vmatprep.subr.bf16.mxu0 %v2791_v10 }
 0x18e   : > { %2503 = vmatprep.subr.bf16.mxu1 %v2791_v10 }
 0x194   : > { %2484 = vmatpush3.bf16.xpose.msra.mxu0 %v2483_v5 }
 0x195   : > { %2505 = vmatpush3.bf16.xpose.msra.mxu1 %v3580_v45  ;;  %2485 = vmatprep.subr.bf16.mxu0 %v2791_v10 }
 0x196   : > { %2506 = vmatprep.subr.bf16.mxu1 %v2791_v10 }
 0x19c   : > { %2487 = vmatpush3.bf16.xpose.msra.mxu0 %v2486_v53 }
 0x19d   : > { %2508 = vmatpush3.bf16.xpose.msra.mxu1 %v3593_v29  ;;  %2512 = vmatprep.subr.bf16.mxu0 %v2791_v10 }
 0x19e   : > { %2509 = vmatprep.subr.bf16.mxu1 %v2791_v10 }
 0x1a3   : > { %2117 = vmatmul.mubr.f32.vlgmr.msra.gmra.mrb[8].mxu0 %v3608_v4 }
 0x1a4   : > { %2514 = vmatpush3.bf16.xpose.msra.mxu0 %v2513_v14  ;;  %2186 = vmatprep.mubr.msk.f32.mxu0 %vm2792_vm0, %v2793_v58 }
 0x1a5   : > { %2511 = vmatpush3.bf16.xpose.msra.mxu1 %v3616_v26  ;;  %2515 = vmatprep.subr.bf16.mxu0 %v2791_v10 }
 0x1a6   : > { %2536 = vmatprep.subr.bf16.mxu1 %v2791_v10 }
 0x1ac   : > { %2152 = vmatmul.mubr.f32.vlgmr.msra.gmra.mrb[8].mxu1 %v1218_v38  ;;  %2517 = vmatpush3.bf16.xpose.msra.mxu0 %v2516_v51 }
 0x1ad   : > { %2538 = vmatpush3.bf16.xpose.msra.mxu1 %v3472_v42  ;;  %2518 = vmatprep.subr.bf16.mxu0 %v2791_v10 }
 0x1ae   : > { %2539 = vmatprep.subr.bf16.mxu1 %v2791_v10  ;;  %2221 = vmatprep.mubr.msk.f32.mxu1 %vm2792_vm0, %v2793_v58  ;;  %v2525_v58 = vpack.c.bf16 %v1292_v32, %v1285_v35 }
 0x1b4   : > { %2520 = vmatpush3.bf16.xpose.msra.mxu0 %v2519_v8 }
 0x1b5   : > { %2541 = vmatpush3.bf16.xpose.msra.mxu1 %v3499_v18  ;;  %2521 = vmatprep.subr.bf16.mxu0 %v2791_v10  ;;  %v2534_v18 = vpack.c.bf16 %v1334_v36, %v1327_v2 }
 0x1b6   : > { %2542 = vmatprep.subr.bf16.mxu1 %v2791_v10  ;;  %v751_v57 = vpop.f32.mrb[2].mxu0 }
 0x1b7   : > { %v752_v39 = vadd.f32 %v751_v57, %v614_v52  ;;  %v753_v42 = vpop.f32.mrb[3].mxu0 }
 0x1bc   : > { %2523 = vmatpush3.bf16.xpose.msra.mxu0 %v2522_v25 }
 0x1bd   : > { %2544 = vmatpush3.bf16.xpose.msra.mxu1 %v3523_v27  ;;  %2524 = vmatprep.subr.bf16.mxu0 %v2791_v10 }
 0x1be   : > { %2545 = vmatprep.subr.bf16.mxu1 %v2791_v10 }
 0x1bf   : > { %v859_v15 = vpop.f32.mrb[2].mxu1 }
 0x1c0   : > { %v860_v16 = vadd.f32 %v859_v15, %v752_v39  ;;  %v861_v41 = vpop.f32.mrb[3].mxu1 }
 0x1c4   : > { %2526 = vmatpush3.bf16.xpose.msra.mxu0 %v2525_v58 }
 0x1c5   : > { %2547 = vmatpush3.bf16.xpose.msra.mxu1 %v3536_v40  ;;  %2527 = vmatprep.subr.bf16.mxu0 %v2791_v10 }
 0x1c6   : > { %2548 = vmatprep.subr.bf16.mxu1 %v2791_v10 }
 0x1cc   : > { %2529 = vmatpush3.bf16.xpose.msra.mxu0 %v2528_v1 }
 0x1cd   : > { %2550 = vmatpush3.bf16.xpose.msra.mxu1 %v3559_v11  ;;  %2530 = vmatprep.subr.bf16.mxu0 %v2791_v10 }
 0x1ce   : > { %2551 = vmatprep.subr.bf16.mxu1 %v2791_v10 }
 0x1d4   : > { %2532 = vmatpush3.bf16.xpose.msra.mxu0 %v2531_v3 }
 0x1d5   : > { %2553 = vmatpush3.bf16.xpose.msra.mxu1 %v3580_v45  ;;  %2533 = vmatprep.subr.bf16.mxu0 %v2791_v10 }
 0x1d6   : > { %2554 = vmatprep.subr.bf16.mxu1 %v2791_v10 }
 0x1dc   : > { %2535 = vmatpush3.bf16.xpose.msra.mxu0 %v2534_v18 }
 0x1dd   : > { %2556 = vmatpush3.bf16.xpose.msra.mxu1 %v3593_v29 }
 0x1de   : > { %2557 = vmatprep.subr.bf16.mxu1 %v2791_v10 }
 0x1e3   : > { %2187 = vmatmul.mubr.f32.vlgmr.msra.gmra.mrb[10].mxu0 %v3595_v21 }
 0x1e5   : > { %2559 = vmatpush3.bf16.xpose.msra.mxu1 %v3616_v26 }
 0x1ec   : > { %2222 = vmatmul.mubr.f32.vlgmr.msra.gmra.mrb[10].mxu1 %v3595_v21 }
 0x1f6   : > { %v1027_v34 = vpop.f32.mrb[4].mxu0 }
 0x1f7   : > { %v1028_v37 = vadd.f32 %v1027_v34, %v860_v16  ;;  %v1029_v27 = vpop.f32.mrb[5].mxu0 }
 0x1ff   : > { %v1131_v46 = vpop.f32.mrb[4].mxu1 }
 0x200   : > { %v1132_v47 = vadd.f32 %v1131_v46, %v1028_v37  ;;  %v1133_v43 = vpop.f32.mrb[5].mxu1 }
 0x236   : > { %v1222_v28 = vpop.f32.mrb[6].mxu0 }
 0x237   : > { %v1223_v40 = vadd.f32 %v1222_v28, %v1132_v47  ;;  %v2048_v30 = vpop.f32.mrb[7].mxu0 }
 0x23f   : > { %v1373_v6 = vpop.f32.mrb[6].mxu1 }
 0x240   : > { %v1374_v35 = vadd.f32 %v1373_v6, %v1223_v40  ;;  %v2083_v10 = vpop.f32.mrb[7].mxu1 }
 0x276   : > { %v1477_v32 = vpop.f32.mrb[8].mxu0 }
 0x277   : > { %v1478_v31 = vadd.f32 %v1477_v32, %v1374_v35  ;;  %v2118_v49 = vpop.f32.mrb[9].mxu0 }
 0x27f   : > { %v1566_v11 = vpop.f32.mrb[8].mxu1 }
 0x280   : > { %v1567_v59 = vadd.f32 %v1566_v11, %v1478_v31  ;;  %v2153_v7 = vpop.f32.mrb[9].mxu1 }
 0x2b6   : > { %v1685_v45 = vpop.f32.mrb[10].mxu0 }
 0x2b7   : > { %v1686_v12 = vadd.f32 %v1685_v45, %v1567_v59  ;;  %v2188_v61 = vpop.f32.mrb[11].mxu0 }
 0x2bf   : > { %v1772_v55 = vpop.f32.mrb[10].mxu1 }
 0x2c0   : > { %v1773_v54 = vadd.f32 %v1772_v55, %v1686_v12  ;;  %v2223_v29 = vpop.f32.mrb[11].mxu1 }
 0x2c2   : > { %1777 = vst [vmem:[%s212_s23] sm:$0xff] %v1773_v54 }
 0x2c3   : > { %2712 = shalt.err (!%p2709_p7)
}
 0x2c4   : > { %s2713_s6 = scalar_lea.hbm %s3744_s29, 128  ;;  %s2717_s19 = scalar_lea.hbm %s3795_s2, 256 }
 0x2c5   : > { %p2714_p13 = scmp.ne.s32.totalorder %s3744_s29, %s2713_s6  ;;  %p2718_p12 = scmp.lt.u32.totalorder %s3744_s29, %s3795_s2 }
 0x2c6   : > { %p2719_p4 = scmp.lt.u32.totalorder %s2717_s19, %s2713_s6  ;;  %p2721_p5 = scmp.lt.u32.totalorder %s2713_s6, %s3744_s29 }
 0x2c7   : > { %p2715_p2 = pnand %p2714_p13, %p3940_p10 }
 0x2c8   : > { %p2720_p8 = por %p2719_p4, %p2718_p12 }
 0x2c9   : > { %p2716_p6 = pneg %p2715_p2 }
 0x2ca   : > { %p2722_p11 = por %p2721_p5, %p2720_p8 }
 0x2cc   : > { %p2723_p1 = pnand %p2722_p11, %p2716_p6 }
 0x2ce   : > { %2726 = shalt.err (!%p2723_p1)
}
 0x2cf   : > { %2569 = dma.vmem_to_hbm [thread:$0]  (%p3940_p10), %s3746_s26, 128, %s3744_s29, %s1779_s5  }
 0x2d0 PF: > { %s1806_s4 = sand.u32 1, %s2765_s9   ;;  %p3941_p0 = scmp.ne.s32.totalorder %s3858_s22, 0 }
 0x2d1   : > { %p3942_p9 = scmp.ge.s32.totalorder %s2785_s14, 2  ;;  %s1807_s18 = scalar_lea.sflag [#allocation4], %s1806_s4 }
 0x2d3   : > { %p2580_p3 = pnand %p3942_p9, %p3941_p0 }
 0x2d5   : > { %2760 = dma.done.wait (!%p2580_p3), %s1807_s18, 128  }
 0x2d6   : > { %2762 = vsyncadd (!%p2580_p3), %s1807_s18, 4294967168  ;;  %s19_s14 = sadd.s32 1, %s2785_s14   ;;  %s3943_s9 = smov %s2769_s10 }
 0x2d7   : > { %p16_p7 = scmp.ge.s32.totalorder %s19_s14, 4   ;;  %s3944_s10 = smov %s2773_s11 }
 0x2d8   : > { %s3945_s11 = smov %s2929_s25  ;;  %s3946_s12 = smov %s2781_s13 }
 0x2d9   : > { %s3947_s13 = smov %s3949_s28  ;;  %18 = sbr.rel (!%p16_p7) target bundleno = 7 (0x7), region = 83 }
 0x2e0   :  { %1812 = vsyncpa [#allocation3], 1 }
 0x2e1   :  { %1814 = vsyncpa [#allocation3 + $0x1], 1 }
 0x2e2   :  { %1815 = vsyncpa [#allocation6], 1 }
 0x2e3   :  { %1817 = vsyncpa [#allocation6 + $0x1], 1 }
 0x2e4   :  { %1818 = vsyncpa [#allocation4], 1 }
 0x2e5   :  { %1820 = vsyncpa [#allocation4 + $0x1], 1 }

</bundles_post_ra>
